<compile_context>
chip_gen: v7x
topology: tpu7x:2x2x1
jax: 0.10.0
libtpu: 0.0.40
codegen_flags: <defaults>
</compile_context>

<pallas_src>
import functools

import jax
import jax.numpy as jnp
from jax.experimental import pallas as pl
from jax.experimental.pallas import tpu as pltpu

HIDDEN = 128      # lane-aligned small hidden size (PyTorch file uses 256)
VOCAB = 40        # output_size
VOCAB_PAD = 128   # lane-dense padded vocab for the log-softmax output
SEQ = 8           # number of fused decode steps in the demo


def _decoder_kernel(tok_ref,     # SMEM (Tp,) int32  token ids (padded with 0)
                    emb_ref,     # VMEM (V, H)  f32  embedding table
                    h0_ref,      # VMEM (1, H)  f32  initial hidden
                    w_ih_ref,    # VMEM (H, 3H) f32  input weights^T  [r|z|n]
                    b_ih_ref,    # VMEM (1, 3H) f32
                    w_hh_ref,    # VMEM (H, 3H) f32  recurrent weights^T [r|z|n]
                    b_hh_ref,    # VMEM (1, 3H) f32
                    w_out_ref,   # VMEM (H, Vp) f32  output projection (padded)
                    b_out_ref,   # VMEM (1, Vp) f32  padded lanes = -1e30
                    logp_ref,    # VMEM out (Tp, Vp) f32 per-step log-probs
                    h_out_ref,   # VMEM out (1, H)   f32 final hidden
                    x_scr,       # VMEM scratch (Tp, H)  f32 relu(embeddings)
                    gx_scr,      # VMEM scratch (Tp, 3H) f32 input projections
                    h_scr,       # VMEM scratch (Tp, H)  f32 per-step hiddens
                    *, n_steps):
    H = h0_ref.shape[1]

    # Zero scratches so padded rows (n_steps..Tp) stay finite in the epilogue.
    x_scr[...] = jnp.zeros_like(x_scr)
    h_scr[...] = jnp.zeros_like(h_scr)

    # --- prologue (non-recurrent): embedding gather + ReLU for all steps ----
    for t in range(n_steps):
        tok = tok_ref[t]
        x_scr[pl.ds(t, 1), :] = jnp.maximum(emb_ref[pl.ds(tok, 1), :], 0.0)

    # --- one batched input projection: Gx = relu(X) @ W_ih^T + b_ih ---------
    gx_scr[...] = (jnp.dot(x_scr[...], w_ih_ref[...],
                           preferred_element_type=jnp.float32)
                   + b_ih_ref[...])                              # (Tp, 3H)

    # --- recurrence: only h @ W_hh^T per step (fully unrolled, T static) ----
    h = h0_ref[...]                                              # (1, H) f32
    for t in range(n_steps):
        gi = gx_scr[pl.ds(t, 1), :]                              # (1, 3H)
        gh = (jnp.dot(h, w_hh_ref[...],
                      preferred_element_type=jnp.float32)
              + b_hh_ref[...])                                   # (1, 3H)
        # PyTorch GRU gate order: r, z, n ;  n = tanh(gi_n + r * gh_n)
        r = jax.nn.sigmoid(gi[:, 0:H] + gh[:, 0:H])
        z = jax.nn.sigmoid(gi[:, H:2 * H] + gh[:, H:2 * H])
        n = jnp.tanh(gi[:, 2 * H:3 * H] + r * gh[:, 2 * H:3 * H])
        h = (1.0 - z) * n + z * h
        h_scr[pl.ds(t, 1), :] = h

    h_out_ref[...] = h

    # --- epilogue: batched output projection + log-softmax over (Tp, Vp) ----
    logits = (jnp.dot(h_scr[...], w_out_ref[...],
                      preferred_element_type=jnp.float32)
              + b_out_ref[...])                                  # (Tp, Vp) f32
    m = jnp.max(logits, axis=1, keepdims=True)
    e = jnp.exp(logits - m)
    s = jnp.sum(e, axis=1, keepdims=True)
    logp_ref[...] = logits - m - jnp.log(s)


def decoder_rnn_decode(tokens, hidden, prep):
    """Run T fused decode steps (teacher-forced token sequence).

    tokens: int32 (T,);  hidden: (1, 1, H) f32.
    Returns (log_probs (T, V), final_hidden (1, 1, H)).
    """
    H = prep["hidden_size"]
    V = prep["vocab"]
    Vp = prep["vocab_pad"]
    n_rows = prep["embedding"].shape[0]

    tokens = jnp.asarray(tokens, jnp.int32).reshape(-1)
    T = int(tokens.shape[0])
    Tp = ((T + 7) // 8) * 8                       # sublane-dense output rows
    # Note: clip keeps OOB token ids from reading past the embedding table
    # (PyTorch would raise instead of remapping).
    tok_pad = jnp.zeros((Tp,), jnp.int32).at[:T].set(
        jnp.clip(tokens, 0, n_rows - 1))
    h0 = hidden.reshape(1, H).astype(jnp.float32)

    flops = 2 * Tp * H * 3 * H + 2 * T * H * 3 * H + 2 * Tp * H * Vp
    cost = pl.CostEstimate(
        flops=int(flops),
        transcendentals=int(T * 3 * H + Tp * (Vp + 1)),
        bytes_accessed=int(prep["embedding"].size * 4
                           + (2 * H * 3 * H + 2 * 3 * H + H * Vp + Vp) * 4
                           + Tp * (Vp + H) * 4),
    )

    vmem = pltpu.MemorySpace.VMEM
    logp, h_new = pl.pallas_call(
        functools.partial(_decoder_kernel, n_steps=T),
        out_shape=(
            jax.ShapeDtypeStruct((Tp, Vp), jnp.float32),
            jax.ShapeDtypeStruct((1, H), jnp.float32),
        ),
        in_specs=[
            pl.BlockSpec(memory_space=pltpu.MemorySpace.SMEM),  # token ids
            pl.BlockSpec(memory_space=vmem),                    # embedding
            pl.BlockSpec(memory_space=vmem),                    # h0
            pl.BlockSpec(memory_space=vmem),                    # w_ih^T
            pl.BlockSpec(memory_space=vmem),                    # b_ih
            pl.BlockSpec(memory_space=vmem),                    # w_hh^T
            pl.BlockSpec(memory_space=vmem),                    # b_hh
            pl.BlockSpec(memory_space=vmem),                    # w_out^T (padded)
            pl.BlockSpec(memory_space=vmem),                    # b_out (padded)
        ],
        out_specs=(
            pl.BlockSpec(memory_space=vmem),
            pl.BlockSpec(memory_space=vmem),
        ),
        scratch_shapes=[
            pltpu.VMEM((Tp, H), jnp.float32),      # relu(embeddings)
            pltpu.VMEM((Tp, 3 * H), jnp.float32),  # input projections
            pltpu.VMEM((Tp, H), jnp.float32),      # per-step hidden states
        ],
        cost_estimate=cost,
    )(tok_pad, prep["embedding"], h0,
      prep["w_ih_t"], prep["b_ih"], prep["w_hh_t"], prep["b_hh"],
      prep["w_out_t"], prep["b_out"])

    return logp[:T, :V], h_new.reshape(1, 1, H)


def decoder_rnn_forward(token, hidden, prep):
    """Single-step API matching the PyTorch module's forward(input, hidden)."""
    logp, h_new = decoder_rnn_decode(jnp.asarray(token, jnp.int32).reshape(1),
                                     hidden, prep)
    return logp, h_new  # (1, V), (1, 1, H)


def init_params(key, hidden_size=HIDDEN, output_size=VOCAB):
    """Raw parameters with the same shapes/layout as the PyTorch module."""
    ks = jax.random.split(key, 7)
    bound = 1.0 / jnp.sqrt(hidden_size)
    u = lambda k, shape: jax.random.uniform(k, shape, jnp.float32, -bound, bound)
    return {
        "embedding": jax.random.normal(ks[0], (output_size, hidden_size), jnp.float32),
        "w_ih": u(ks[1], (3 * hidden_size, hidden_size)),   # [W_ir; W_iz; W_in]
        "w_hh": u(ks[2], (3 * hidden_size, hidden_size)),   # [W_hr; W_hz; W_hn]
        "b_ih": u(ks[3], (3 * hidden_size,)),
        "b_hh": u(ks[4], (3 * hidden_size,)),
        "w_out": u(ks[5], (output_size, hidden_size)),
        "b_out": u(ks[6], (output_size,)),
    }


def prepare_params(raw, vocab_pad=VOCAB_PAD):
    """One-time parameter prep: transpose GRU weights, pad vocab. All f32."""
    H = raw["w_hh"].shape[1]
    V = raw["w_out"].shape[0]

    w_ih_t = raw["w_ih"].T.astype(jnp.float32)               # (H, 3H) [r|z|n]
    w_hh_t = raw["w_hh"].T.astype(jnp.float32)               # (H, 3H) [r|z|n]
    b_ih = raw["b_ih"].reshape(1, 3 * H).astype(jnp.float32)
    b_hh = raw["b_hh"].reshape(1, 3 * H).astype(jnp.float32)

    w_out_t = (jnp.zeros((H, vocab_pad), jnp.float32)
               .at[:, :V].set(raw["w_out"].T.astype(jnp.float32)))
    b_out = (jnp.full((vocab_pad,), -1e30, jnp.float32)      # padded lanes -> exp()==0
             .at[:V].set(raw["b_out"].astype(jnp.float32))
             .reshape(1, vocab_pad))

    return {
        "embedding": raw["embedding"].astype(jnp.float32),
        "w_ih_t": w_ih_t, "b_ih": b_ih,
        "w_hh_t": w_hh_t, "b_hh": b_hh,
        "w_out_t": w_out_t, "b_out": b_out,
        "hidden_size": H, "vocab": V, "vocab_pad": vocab_pad,
    }


def _reference_decode(tokens, hidden, raw):
    """Pure-JAX f32 reference mirroring the PyTorch forward exactly."""
    H = raw["w_hh"].shape[1]
    dot = functools.partial(jnp.dot, precision=jax.lax.Precision.HIGHEST)
    h = hidden.reshape(1, H).astype(jnp.float32)
    outs = []
    for t in range(int(tokens.shape[0])):
        x = jnp.maximum(raw["embedding"][tokens[t]].reshape(1, H), 0.0)
        gi = dot(x, raw["w_ih"].T) + raw["b_ih"]
        gh = dot(h, raw["w_hh"].T) + raw["b_hh"]
        r = jax.nn.sigmoid(gi[:, :H] + gh[:, :H])
        z = jax.nn.sigmoid(gi[:, H:2 * H] + gh[:, H:2 * H])
        n = jnp.tanh(gi[:, 2 * H:] + r * gh[:, 2 * H:])
        h = (1.0 - z) * n + z * h
        logits = dot(h, raw["w_out"].T) + raw["b_out"]
        outs.append(jax.nn.log_softmax(logits, axis=1))
    return jnp.concatenate(outs, axis=0), h.reshape(1, 1, H)


if __name__ == "__main__":
    key = jax.random.PRNGKey(0)
    raw_params = init_params(key)
    prep = prepare_params(raw_params)

    tokens = jax.random.randint(jax.random.PRNGKey(1), (SEQ,), 0, VOCAB, jnp.int32)
    hidden = jnp.zeros((1, 1, HIDDEN), dtype=jnp.float32)   # initHidden()

    # Fused multi-step decode (all SEQ steps in ONE gridless pallas_call).
    logp_seq, h_final = decoder_rnn_decode(tokens, hidden, prep)
    jax.block_until_ready((logp_seq, h_final))

    ref_logp, ref_h = _reference_decode(tokens, hidden, raw_params)
    assert logp_seq.shape == (SEQ, VOCAB) and h_final.shape == (1, 1, HIDDEN)
    assert jnp.allclose(logp_seq, ref_logp, atol=2e-3), \
        float(jnp.max(jnp.abs(logp_seq - ref_logp)))
    assert jnp.allclose(h_final, ref_h, atol=2e-3), \
        float(jnp.max(jnp.abs(h_final - ref_h)))

    # Single-step API (matches the PyTorch module's forward signature).
    logp1, h1 = decoder_rnn_forward(tokens[0], hidden, prep)
    jax.block_until_ready((logp1, h1))
    assert logp1.shape == (1, VOCAB) and h1.shape == (1, 1, HIDDEN)
    assert jnp.allclose(logp1, logp_seq[0:1], atol=1e-4)

    print("KERNEL_OK")
</pallas_src>

<mosaic_0001>
module attributes {stable_mosaic.version = 11 : i64} {
  func.func @_decoder_kernel(%arg0: memref<8xi32, #tpu.memory_space<smem>>, %arg1: memref<40x128xf32, #tpu.memory_space<vmem>>, %arg2: memref<1x128xf32, #tpu.memory_space<vmem>>, %arg3: memref<128x384xf32, #tpu.memory_space<vmem>>, %arg4: memref<1x384xf32, #tpu.memory_space<vmem>>, %arg5: memref<128x384xf32, #tpu.memory_space<vmem>>, %arg6: memref<1x384xf32, #tpu.memory_space<vmem>>, %arg7: memref<128x128xf32, #tpu.memory_space<vmem>>, %arg8: memref<1x128xf32, #tpu.memory_space<vmem>>, %arg9: memref<8x128xf32, #tpu.memory_space<vmem>>, %arg10: memref<1x128xf32, #tpu.memory_space<vmem>>, %arg11: memref<8x128xf32, #tpu.memory_space<vmem>>, %arg12: memref<8x384xf32, #tpu.memory_space<vmem>>, %arg13: memref<8x128xf32, #tpu.memory_space<vmem>>) attributes {dimension_semantics = [], scalar_prefetch = 0 : i64, scratch_operands = 3 : i64, tpu.core_type = #tpu.core_type<tc>} {
    %cst = arith.constant 0.000000e+00 : f32
    %0 = vector.broadcast %cst : f32 to vector<8x128xf32>
    %c0 = arith.constant 0 : index
    %c0_0 = arith.constant 0 : index
    %1 = vector.load %arg11[%c0, %c0_0] : memref<8x128xf32, #tpu.memory_space<vmem>>, vector<8x128xf32>
    tpu.vector_store %arg11[%c0, %c0_0], %0 {strides = array<i32>} : memref<8x128xf32, #tpu.memory_space<vmem>>, vector<8x128xf32>,
    %cst_1 = arith.constant 0.000000e+00 : f32
    %2 = vector.broadcast %cst_1 : f32 to vector<8x128xf32>
    %c0_2 = arith.constant 0 : index
    %c0_3 = arith.constant 0 : index
    %3 = vector.load %arg13[%c0_2, %c0_3] : memref<8x128xf32, #tpu.memory_space<vmem>>, vector<8x128xf32>
    tpu.vector_store %arg13[%c0_2, %c0_3], %2 {strides = array<i32>} : memref<8x128xf32, #tpu.memory_space<vmem>>, vector<8x128xf32>,
    %c0_4 = arith.constant 0 : index
    %4 = memref.load %arg0[%c0_4] : memref<8xi32, #tpu.memory_space<smem>>
    %5 = arith.index_cast %4 : i32 to index
    %c0_5 = arith.constant 0 : index
    %6 = vector.load %arg1[%5, %c0_5] : memref<40x128xf32, #tpu.memory_space<vmem>>, vector<1x128xf32>
    %cst_6 = arith.constant 0.000000e+00 : f32
    %7 = vector.broadcast %cst_6 : f32 to vector<1x128xf32>
    %8 = arith.maximumf %6, %7 : vector<1x128xf32>
    %c0_7 = arith.constant 0 : index
    %c0_8 = arith.constant 0 : index
    %9 = vector.load %arg11[%c0_7, %c0_8] : memref<8x128xf32, #tpu.memory_space<vmem>>, vector<1x128xf32>
    tpu.vector_store %arg11[%c0_7, %c0_8], %8 {strides = array<i32>} : memref<8x128xf32, #tpu.memory_space<vmem>>, vector<1x128xf32>,
    %c1 = arith.constant 1 : index
    %10 = memref.load %arg0[%c1] : memref<8xi32, #tpu.memory_space<smem>>
    %11 = arith.index_cast %10 : i32 to index
    %c0_9 = arith.constant 0 : index
    %12 = vector.load %arg1[%11, %c0_9] : memref<40x128xf32, #tpu.memory_space<vmem>>, vector<1x128xf32>
    %cst_10 = arith.constant 0.000000e+00 : f32
    %13 = vector.broadcast %cst_10 : f32 to vector<1x128xf32>
    %14 = arith.maximumf %12, %13 : vector<1x128xf32>
    %c1_11 = arith.constant 1 : index
    %c0_12 = arith.constant 0 : index
    %15 = vector.load %arg11[%c1_11, %c0_12] : memref<8x128xf32, #tpu.memory_space<vmem>>, vector<1x128xf32>
    tpu.vector_store %arg11[%c1_11, %c0_12], %14 {strides = array<i32>} : memref<8x128xf32, #tpu.memory_space<vmem>>, vector<1x128xf32>,
    %c2 = arith.constant 2 : index
    %16 = memref.load %arg0[%c2] : memref<8xi32, #tpu.memory_space<smem>>
    %17 = arith.index_cast %16 : i32 to index
    %c0_13 = arith.constant 0 : index
    %18 = vector.load %arg1[%17, %c0_13] : memref<40x128xf32, #tpu.memory_space<vmem>>, vector<1x128xf32>
    %cst_14 = arith.constant 0.000000e+00 : f32
    %19 = vector.broadcast %cst_14 : f32 to vector<1x128xf32>
    %20 = arith.maximumf %18, %19 : vector<1x128xf32>
    %c2_15 = arith.constant 2 : index
    %c0_16 = arith.constant 0 : index
    %21 = vector.load %arg11[%c2_15, %c0_16] : memref<8x128xf32, #tpu.memory_space<vmem>>, vector<1x128xf32>
    tpu.vector_store %arg11[%c2_15, %c0_16], %20 {strides = array<i32>} : memref<8x128xf32, #tpu.memory_space<vmem>>, vector<1x128xf32>,
    %c3 = arith.constant 3 : index
    %22 = memref.load %arg0[%c3] : memref<8xi32, #tpu.memory_space<smem>>
    %23 = arith.index_cast %22 : i32 to index
    %c0_17 = arith.constant 0 : index
    %24 = vector.load %arg1[%23, %c0_17] : memref<40x128xf32, #tpu.memory_space<vmem>>, vector<1x128xf32>
    %cst_18 = arith.constant 0.000000e+00 : f32
    %25 = vector.broadcast %cst_18 : f32 to vector<1x128xf32>
    %26 = arith.maximumf %24, %25 : vector<1x128xf32>
    %c3_19 = arith.constant 3 : index
    %c0_20 = arith.constant 0 : index
    %27 = vector.load %arg11[%c3_19, %c0_20] : memref<8x128xf32, #tpu.memory_space<vmem>>, vector<1x128xf32>
    tpu.vector_store %arg11[%c3_19, %c0_20], %26 {strides = array<i32>} : memref<8x128xf32, #tpu.memory_space<vmem>>, vector<1x128xf32>,
    %c4 = arith.constant 4 : index
    %28 = memref.load %arg0[%c4] : memref<8xi32, #tpu.memory_space<smem>>
    %29 = arith.index_cast %28 : i32 to index
    %c0_21 = arith.constant 0 : index
    %30 = vector.load %arg1[%29, %c0_21] : memref<40x128xf32, #tpu.memory_space<vmem>>, vector<1x128xf32>
    %cst_22 = arith.constant 0.000000e+00 : f32
    %31 = vector.broadcast %cst_22 : f32 to vector<1x128xf32>
    %32 = arith.maximumf %30, %31 : vector<1x128xf32>
    %c4_23 = arith.constant 4 : index
    %c0_24 = arith.constant 0 : index
    %33 = vector.load %arg11[%c4_23, %c0_24] : memref<8x128xf32, #tpu.memory_space<vmem>>, vector<1x128xf32>
    tpu.vector_store %arg11[%c4_23, %c0_24], %32 {strides = array<i32>} : memref<8x128xf32, #tpu.memory_space<vmem>>, vector<1x128xf32>,
    %c5 = arith.constant 5 : index
    %34 = memref.load %arg0[%c5] : memref<8xi32, #tpu.memory_space<smem>>
    %35 = arith.index_cast %34 : i32 to index
    %c0_25 = arith.constant 0 : index
    %36 = vector.load %arg1[%35, %c0_25] : memref<40x128xf32, #tpu.memory_space<vmem>>, vector<1x128xf32>
    %cst_26 = arith.constant 0.000000e+00 : f32
    %37 = vector.broadcast %cst_26 : f32 to vector<1x128xf32>
    %38 = arith.maximumf %36, %37 : vector<1x128xf32>
    %c5_27 = arith.constant 5 : index
    %c0_28 = arith.constant 0 : index
    %39 = vector.load %arg11[%c5_27, %c0_28] : memref<8x128xf32, #tpu.memory_space<vmem>>, vector<1x128xf32>
    tpu.vector_store %arg11[%c5_27, %c0_28], %38 {strides = array<i32>} : memref<8x128xf32, #tpu.memory_space<vmem>>, vector<1x128xf32>,
    %c6 = arith.constant 6 : index
    %40 = memref.load %arg0[%c6] : memref<8xi32, #tpu.memory_space<smem>>
    %41 = arith.index_cast %40 : i32 to index
    %c0_29 = arith.constant 0 : index
    %42 = vector.load %arg1[%41, %c0_29] : memref<40x128xf32, #tpu.memory_space<vmem>>, vector<1x128xf32>
    %cst_30 = arith.constant 0.000000e+00 : f32
    %43 = vector.broadcast %cst_30 : f32 to vector<1x128xf32>
    %44 = arith.maximumf %42, %43 : vector<1x128xf32>
    %c6_31 = arith.constant 6 : index
    %c0_32 = arith.constant 0 : index
    %45 = vector.load %arg11[%c6_31, %c0_32] : memref<8x128xf32, #tpu.memory_space<vmem>>, vector<1x128xf32>
    tpu.vector_store %arg11[%c6_31, %c0_32], %44 {strides = array<i32>} : memref<8x128xf32, #tpu.memory_space<vmem>>, vector<1x128xf32>,
    %c7 = arith.constant 7 : index
    %46 = memref.load %arg0[%c7] : memref<8xi32, #tpu.memory_space<smem>>
    %47 = arith.index_cast %46 : i32 to index
    %c0_33 = arith.constant 0 : index
    %48 = vector.load %arg1[%47, %c0_33] : memref<40x128xf32, #tpu.memory_space<vmem>>, vector<1x128xf32>
    %cst_34 = arith.constant 0.000000e+00 : f32
    %49 = vector.broadcast %cst_34 : f32 to vector<1x128xf32>
    %50 = arith.maximumf %48, %49 : vector<1x128xf32>
    %c7_35 = arith.constant 7 : index
    %c0_36 = arith.constant 0 : index
    %51 = vector.load %arg11[%c7_35, %c0_36] : memref<8x128xf32, #tpu.memory_space<vmem>>, vector<1x128xf32>
    tpu.vector_store %arg11[%c7_35, %c0_36], %50 {strides = array<i32>} : memref<8x128xf32, #tpu.memory_space<vmem>>, vector<1x128xf32>,
    %c0_37 = arith.constant 0 : index
    %c0_38 = arith.constant 0 : index
    %52 = vector.load %arg11[%c0_37, %c0_38] : memref<8x128xf32, #tpu.memory_space<vmem>>, vector<8x128xf32>
    %c0_39 = arith.constant 0 : index
    %c0_40 = arith.constant 0 : index
    %53 = vector.load %arg3[%c0_39, %c0_40] : memref<128x384xf32, #tpu.memory_space<vmem>>, vector<128x384xf32>
    %cst_41 = arith.constant dense<0.000000e+00> : vector<8x384xf32>
    %54 = tpu.matmul %52, %53, %cst_41 {dimension_numbers = #tpu.dot_dimension_numbers<[1], [0], [0], [1], [0, 0, 1, 1], [], []>} : vector<8x128xf32>, vector<128x384xf32>, vector<8x384xf32> -> vector<8x384xf32>
    %c0_42 = arith.constant 0 : index
    %c0_43 = arith.constant 0 : index
    %55 = vector.load %arg4[%c0_42, %c0_43] : memref<1x384xf32, #tpu.memory_space<vmem>>, vector<1x384xf32>
    %56 = vector.broadcast %55 : vector<1x384xf32> to vector<8x384xf32>
    %57 = arith.addf %54, %56 : vector<8x384xf32>
    %c0_44 = arith.constant 0 : index
    %c0_45 = arith.constant 0 : index
    %58 = vector.load %arg12[%c0_44, %c0_45] : memref<8x384xf32, #tpu.memory_space<vmem>>, vector<8x384xf32>
    tpu.vector_store %arg12[%c0_44, %c0_45], %57 {strides = array<i32>} : memref<8x384xf32, #tpu.memory_space<vmem>>, vector<8x384xf32>,
    %c0_46 = arith.constant 0 : index
    %c0_47 = arith.constant 0 : index
    %59 = vector.load %arg2[%c0_46, %c0_47] : memref<1x128xf32, #tpu.memory_space<vmem>>, vector<1x128xf32>
    %c0_48 = arith.constant 0 : index
    %c0_49 = arith.constant 0 : index
    %60 = vector.load %arg12[%c0_48, %c0_49] : memref<8x384xf32, #tpu.memory_space<vmem>>, vector<1x384xf32>
    %c0_50 = arith.constant 0 : index
    %c0_51 = arith.constant 0 : index
    %61 = vector.load %arg5[%c0_50, %c0_51] : memref<128x384xf32, #tpu.memory_space<vmem>>, vector<128x384xf32>
    %cst_52 = arith.constant dense<0.000000e+00> : vector<1x384xf32>
    %62 = tpu.matmul %59, %61, %cst_52 {dimension_numbers = #tpu.dot_dimension_numbers<[1], [0], [0], [1], [0, 0, 1, 1], [], []>} : vector<1x128xf32>, vector<128x384xf32>, vector<1x384xf32> -> vector<1x384xf32>
    %c0_53 = arith.constant 0 : index
    %c0_54 = arith.constant 0 : index
    %63 = vector.load %arg6[%c0_53, %c0_54] : memref<1x384xf32, #tpu.memory_space<vmem>>, vector<1x384xf32>
    %64 = arith.addf %62, %63 : vector<1x384xf32>
    %65 = vector.extract_strided_slice %60 {offsets = [0, 0], sizes = [1, 128], strides = [1, 1]} : vector<1x384xf32> to vector<1x128xf32>
    %66 = vector.extract_strided_slice %64 {offsets = [0, 0], sizes = [1, 128], strides = [1, 1]} : vector<1x384xf32> to vector<1x128xf32>
    %67 = arith.addf %65, %66 : vector<1x128xf32>
    %68 = arith.negf %67 : vector<1x128xf32>
    %69 = math.exp %68 : vector<1x128xf32>
    %cst_55 = arith.constant 1.000000e+00 : f32
    %70 = vector.broadcast %cst_55 : f32 to vector<1x128xf32>
    %71 = arith.addf %70, %69 : vector<1x128xf32>
    %72 = arith.divf %70, %71 : vector<1x128xf32>
    %73 = vector.extract_strided_slice %60 {offsets = [0, 128], sizes = [1, 128], strides = [1, 1]} : vector<1x384xf32> to vector<1x128xf32>
    %74 = vector.extract_strided_slice %64 {offsets = [0, 128], sizes = [1, 128], strides = [1, 1]} : vector<1x384xf32> to vector<1x128xf32>
    %75 = arith.addf %73, %74 : vector<1x128xf32>
    %76 = arith.negf %75 : vector<1x128xf32>
    %77 = math.exp %76 : vector<1x128xf32>
    %cst_56 = arith.constant 1.000000e+00 : f32
    %78 = vector.broadcast %cst_56 : f32 to vector<1x128xf32>
    %79 = arith.addf %78, %77 : vector<1x128xf32>
    %80 = arith.divf %78, %79 : vector<1x128xf32>
    %81 = vector.extract_strided_slice %60 {offsets = [0, 256], sizes = [1, 128], strides = [1, 1]} : vector<1x384xf32> to vector<1x128xf32>
    %82 = vector.extract_strided_slice %64 {offsets = [0, 256], sizes = [1, 128], strides = [1, 1]} : vector<1x384xf32> to vector<1x128xf32>
    %83 = arith.mulf %72, %82 : vector<1x128xf32>
    %84 = arith.addf %81, %83 : vector<1x128xf32>
    %85 = math.tanh %84 : vector<1x128xf32>
    %cst_57 = arith.constant 1.000000e+00 : f32
    %86 = vector.broadcast %cst_57 : f32 to vector<1x128xf32>
    %87 = arith.subf %86, %80 : vector<1x128xf32>
    %88 = arith.mulf %87, %85 : vector<1x128xf32>
    %89 = arith.mulf %80, %59 : vector<1x128xf32>
    %90 = arith.addf %88, %89 : vector<1x128xf32>
    %c0_58 = arith.constant 0 : index
    %c0_59 = arith.constant 0 : index
    %91 = vector.load %arg13[%c0_58, %c0_59] : memref<8x128xf32, #tpu.memory_space<vmem>>, vector<1x128xf32>
    tpu.vector_store %arg13[%c0_58, %c0_59], %90 {strides = array<i32>} : memref<8x128xf32, #tpu.memory_space<vmem>>, vector<1x128xf32>,
    %c1_60 = arith.constant 1 : index
    %c0_61 = arith.constant 0 : index
    %92 = vector.load %arg12[%c1_60, %c0_61] : memref<8x384xf32, #tpu.memory_space<vmem>>, vector<1x384xf32>
    %c0_62 = arith.constant 0 : index
    %c0_63 = arith.constant 0 : index
    %93 = vector.load %arg5[%c0_62, %c0_63] : memref<128x384xf32, #tpu.memory_space<vmem>>, vector<128x384xf32>
    %cst_64 = arith.constant dense<0.000000e+00> : vector<1x384xf32>
    %94 = tpu.matmul %90, %93, %cst_64 {dimension_numbers = #tpu.dot_dimension_numbers<[1], [0], [0], [1], [0, 0, 1, 1], [], []>} : vector<1x128xf32>, vector<128x384xf32>, vector<1x384xf32> -> vector<1x384xf32>
    %c0_65 = arith.constant 0 : index
    %c0_66 = arith.constant 0 : index
    %95 = vector.load %arg6[%c0_65, %c0_66] : memref<1x384xf32, #tpu.memory_space<vmem>>, vector<1x384xf32>
    %96 = arith.addf %94, %95 : vector<1x384xf32>
    %97 = vector.extract_strided_slice %92 {offsets = [0, 0], sizes = [1, 128], strides = [1, 1]} : vector<1x384xf32> to vector<1x128xf32>
    %98 = vector.extract_strided_slice %96 {offsets = [0, 0], sizes = [1, 128], strides = [1, 1]} : vector<1x384xf32> to vector<1x128xf32>
    %99 = arith.addf %97, %98 : vector<1x128xf32>
    %100 = arith.negf %99 : vector<1x128xf32>
    %101 = math.exp %100 : vector<1x128xf32>
    %cst_67 = arith.constant 1.000000e+00 : f32
    %102 = vector.broadcast %cst_67 : f32 to vector<1x128xf32>
    %103 = arith.addf %102, %101 : vector<1x128xf32>
    %104 = arith.divf %102, %103 : vector<1x128xf32>
    %105 = vector.extract_strided_slice %92 {offsets = [0, 128], sizes = [1, 128], strides = [1, 1]} : vector<1x384xf32> to vector<1x128xf32>
    %106 = vector.extract_strided_slice %96 {offsets = [0, 128], sizes = [1, 128], strides = [1, 1]} : vector<1x384xf32> to vector<1x128xf32>
    %107 = arith.addf %105, %106 : vector<1x128xf32>
    %108 = arith.negf %107 : vector<1x128xf32>
    %109 = math.exp %108 : vector<1x128xf32>
    %cst_68 = arith.constant 1.000000e+00 : f32
    %110 = vector.broadcast %cst_68 : f32 to vector<1x128xf32>
    %111 = arith.addf %110, %109 : vector<1x128xf32>
    %112 = arith.divf %110, %111 : vector<1x128xf32>
    %113 = vector.extract_strided_slice %92 {offsets = [0, 256], sizes = [1, 128], strides = [1, 1]} : vector<1x384xf32> to vector<1x128xf32>
    %114 = vector.extract_strided_slice %96 {offsets = [0, 256], sizes = [1, 128], strides = [1, 1]} : vector<1x384xf32> to vector<1x128xf32>
    %115 = arith.mulf %104, %114 : vector<1x128xf32>
    %116 = arith.addf %113, %115 : vector<1x128xf32>
    %117 = math.tanh %116 : vector<1x128xf32>
    %cst_69 = arith.constant 1.000000e+00 : f32
    %118 = vector.broadcast %cst_69 : f32 to vector<1x128xf32>
    %119 = arith.subf %118, %112 : vector<1x128xf32>
    %120 = arith.mulf %119, %117 : vector<1x128xf32>
    %121 = arith.mulf %112, %90 : vector<1x128xf32>
    %122 = arith.addf %120, %121 : vector<1x128xf32>
    %c1_70 = arith.constant 1 : index
    %c0_71 = arith.constant 0 : index
    %123 = vector.load %arg13[%c1_70, %c0_71] : memref<8x128xf32, #tpu.memory_space<vmem>>, vector<1x128xf32>
    tpu.vector_store %arg13[%c1_70, %c0_71], %122 {strides = array<i32>} : memref<8x128xf32, #tpu.memory_space<vmem>>, vector<1x128xf32>,
    %c2_72 = arith.constant 2 : index
    %c0_73 = arith.constant 0 : index
    %124 = vector.load %arg12[%c2_72, %c0_73] : memref<8x384xf32, #tpu.memory_space<vmem>>, vector<1x384xf32>
    %c0_74 = arith.constant 0 : index
    %c0_75 = arith.constant 0 : index
    %125 = vector.load %arg5[%c0_74, %c0_75] : memref<128x384xf32, #tpu.memory_space<vmem>>, vector<128x384xf32>
    %cst_76 = arith.constant dense<0.000000e+00> : vector<1x384xf32>
    %126 = tpu.matmul %122, %125, %cst_76 {dimension_numbers = #tpu.dot_dimension_numbers<[1], [0], [0], [1], [0, 0, 1, 1], [], []>} : vector<1x128xf32>, vector<128x384xf32>, vector<1x384xf32> -> vector<1x384xf32>
    %c0_77 = arith.constant 0 : index
    %c0_78 = arith.constant 0 : index
    %127 = vector.load %arg6[%c0_77, %c0_78] : memref<1x384xf32, #tpu.memory_space<vmem>>, vector<1x384xf32>
    %128 = arith.addf %126, %127 : vector<1x384xf32>
    %129 = vector.extract_strided_slice %124 {offsets = [0, 0], sizes = [1, 128], strides = [1, 1]} : vector<1x384xf32> to vector<1x128xf32>
    %130 = vector.extract_strided_slice %128 {offsets = [0, 0], sizes = [1, 128], strides = [1, 1]} : vector<1x384xf32> to vector<1x128xf32>
    %131 = arith.addf %129, %130 : vector<1x128xf32>
    %132 = arith.negf %131 : vector<1x128xf32>
    %133 = math.exp %132 : vector<1x128xf32>
    %cst_79 = arith.constant 1.000000e+00 : f32
    %134 = vector.broadcast %cst_79 : f32 to vector<1x128xf32>
    %135 = arith.addf %134, %133 : vector<1x128xf32>
    %136 = arith.divf %134, %135 : vector<1x128xf32>
    %137 = vector.extract_strided_slice %124 {offsets = [0, 128], sizes = [1, 128], strides = [1, 1]} : vector<1x384xf32> to vector<1x128xf32>
    %138 = vector.extract_strided_slice %128 {offsets = [0, 128], sizes = [1, 128], strides = [1, 1]} : vector<1x384xf32> to vector<1x128xf32>
    %139 = arith.addf %137, %138 : vector<1x128xf32>
    %140 = arith.negf %139 : vector<1x128xf32>
    %141 = math.exp %140 : vector<1x128xf32>
    %cst_80 = arith.constant 1.000000e+00 : f32
    %142 = vector.broadcast %cst_80 : f32 to vector<1x128xf32>
    %143 = arith.addf %142, %141 : vector<1x128xf32>
    %144 = arith.divf %142, %143 : vector<1x128xf32>
    %145 = vector.extract_strided_slice %124 {offsets = [0, 256], sizes = [1, 128], strides = [1, 1]} : vector<1x384xf32> to vector<1x128xf32>
    %146 = vector.extract_strided_slice %128 {offsets = [0, 256], sizes = [1, 128], strides = [1, 1]} : vector<1x384xf32> to vector<1x128xf32>
    %147 = arith.mulf %136, %146 : vector<1x128xf32>
    %148 = arith.addf %145, %147 : vector<1x128xf32>
    %149 = math.tanh %148 : vector<1x128xf32>
    %cst_81 = arith.constant 1.000000e+00 : f32
    %150 = vector.broadcast %cst_81 : f32 to vector<1x128xf32>
    %151 = arith.subf %150, %144 : vector<1x128xf32>
    %152 = arith.mulf %151, %149 : vector<1x128xf32>
    %153 = arith.mulf %144, %122 : vector<1x128xf32>
    %154 = arith.addf %152, %153 : vector<1x128xf32>
    %c2_82 = arith.constant 2 : index
    %c0_83 = arith.constant 0 : index
    %155 = vector.load %arg13[%c2_82, %c0_83] : memref<8x128xf32, #tpu.memory_space<vmem>>, vector<1x128xf32>
    tpu.vector_store %arg13[%c2_82, %c0_83], %154 {strides = array<i32>} : memref<8x128xf32, #tpu.memory_space<vmem>>, vector<1x128xf32>,
    %c3_84 = arith.constant 3 : index
    %c0_85 = arith.constant 0 : index
    %156 = vector.load %arg12[%c3_84, %c0_85] : memref<8x384xf32, #tpu.memory_space<vmem>>, vector<1x384xf32>
    %c0_86 = arith.constant 0 : index
    %c0_87 = arith.constant 0 : index
    %157 = vector.load %arg5[%c0_86, %c0_87] : memref<128x384xf32, #tpu.memory_space<vmem>>, vector<128x384xf32>
    %cst_88 = arith.constant dense<0.000000e+00> : vector<1x384xf32>
    %158 = tpu.matmul %154, %157, %cst_88 {dimension_numbers = #tpu.dot_dimension_numbers<[1], [0], [0], [1], [0, 0, 1, 1], [], []>} : vector<1x128xf32>, vector<128x384xf32>, vector<1x384xf32> -> vector<1x384xf32>
    %c0_89 = arith.constant 0 : index
    %c0_90 = arith.constant 0 : index
    %159 = vector.load %arg6[%c0_89, %c0_90] : memref<1x384xf32, #tpu.memory_space<vmem>>, vector<1x384xf32>
    %160 = arith.addf %158, %159 : vector<1x384xf32>
    %161 = vector.extract_strided_slice %156 {offsets = [0, 0], sizes = [1, 128], strides = [1, 1]} : vector<1x384xf32> to vector<1x128xf32>
    %162 = vector.extract_strided_slice %160 {offsets = [0, 0], sizes = [1, 128], strides = [1, 1]} : vector<1x384xf32> to vector<1x128xf32>
    %163 = arith.addf %161, %162 : vector<1x128xf32>
    %164 = arith.negf %163 : vector<1x128xf32>
    %165 = math.exp %164 : vector<1x128xf32>
    %cst_91 = arith.constant 1.000000e+00 : f32
    %166 = vector.broadcast %cst_91 : f32 to vector<1x128xf32>
    %167 = arith.addf %166, %165 : vector<1x128xf32>
    %168 = arith.divf %166, %167 : vector<1x128xf32>
    %169 = vector.extract_strided_slice %156 {offsets = [0, 128], sizes = [1, 128], strides = [1, 1]} : vector<1x384xf32> to vector<1x128xf32>
    %170 = vector.extract_strided_slice %160 {offsets = [0, 128], sizes = [1, 128], strides = [1, 1]} : vector<1x384xf32> to vector<1x128xf32>
    %171 = arith.addf %169, %170 : vector<1x128xf32>
    %172 = arith.negf %171 : vector<1x128xf32>
    %173 = math.exp %172 : vector<1x128xf32>
    %cst_92 = arith.constant 1.000000e+00 : f32
    %174 = vector.broadcast %cst_92 : f32 to vector<1x128xf32>
    %175 = arith.addf %174, %173 : vector<1x128xf32>
    %176 = arith.divf %174, %175 : vector<1x128xf32>
    %177 = vector.extract_strided_slice %156 {offsets = [0, 256], sizes = [1, 128], strides = [1, 1]} : vector<1x384xf32> to vector<1x128xf32>
    %178 = vector.extract_strided_slice %160 {offsets = [0, 256], sizes = [1, 128], strides = [1, 1]} : vector<1x384xf32> to vector<1x128xf32>
    %179 = arith.mulf %168, %178 : vector<1x128xf32>
    %180 = arith.addf %177, %179 : vector<1x128xf32>
    %181 = math.tanh %180 : vector<1x128xf32>
    %cst_93 = arith.constant 1.000000e+00 : f32
    %182 = vector.broadcast %cst_93 : f32 to vector<1x128xf32>
    %183 = arith.subf %182, %176 : vector<1x128xf32>
    %184 = arith.mulf %183, %181 : vector<1x128xf32>
    %185 = arith.mulf %176, %154 : vector<1x128xf32>
    %186 = arith.addf %184, %185 : vector<1x128xf32>
    %c3_94 = arith.constant 3 : index
    %c0_95 = arith.constant 0 : index
    %187 = vector.load %arg13[%c3_94, %c0_95] : memref<8x128xf32, #tpu.memory_space<vmem>>, vector<1x128xf32>
    tpu.vector_store %arg13[%c3_94, %c0_95], %186 {strides = array<i32>} : memref<8x128xf32, #tpu.memory_space<vmem>>, vector<1x128xf32>,
    %c4_96 = arith.constant 4 : index
    %c0_97 = arith.constant 0 : index
    %188 = vector.load %arg12[%c4_96, %c0_97] : memref<8x384xf32, #tpu.memory_space<vmem>>, vector<1x384xf32>
    %c0_98 = arith.constant 0 : index
    %c0_99 = arith.constant 0 : index
    %189 = vector.load %arg5[%c0_98, %c0_99] : memref<128x384xf32, #tpu.memory_space<vmem>>, vector<128x384xf32>
    %cst_100 = arith.constant dense<0.000000e+00> : vector<1x384xf32>
    %190 = tpu.matmul %186, %189, %cst_100 {dimension_numbers = #tpu.dot_dimension_numbers<[1], [0], [0], [1], [0, 0, 1, 1], [], []>} : vector<1x128xf32>, vector<128x384xf32>, vector<1x384xf32> -> vector<1x384xf32>
    %c0_101 = arith.constant 0 : index
    %c0_102 = arith.constant 0 : index
    %191 = vector.load %arg6[%c0_101, %c0_102] : memref<1x384xf32, #tpu.memory_space<vmem>>, vector<1x384xf32>
    %192 = arith.addf %190, %191 : vector<1x384xf32>
    %193 = vector.extract_strided_slice %188 {offsets = [0, 0], sizes = [1, 128], strides = [1, 1]} : vector<1x384xf32> to vector<1x128xf32>
    %194 = vector.extract_strided_slice %192 {offsets = [0, 0], sizes = [1, 128], strides = [1, 1]} : vector<1x384xf32> to vector<1x128xf32>
    %195 = arith.addf %193, %194 : vector<1x128xf32>
    %196 = arith.negf %195 : vector<1x128xf32>
    %197 = math.exp %196 : vector<1x128xf32>
    %cst_103 = arith.constant 1.000000e+00 : f32
    %198 = vector.broadcast %cst_103 : f32 to vector<1x128xf32>
    %199 = arith.addf %198, %197 : vector<1x128xf32>
    %200 = arith.divf %198, %199 : vector<1x128xf32>
    %201 = vector.extract_strided_slice %188 {offsets = [0, 128], sizes = [1, 128], strides = [1, 1]} : vector<1x384xf32> to vector<1x128xf32>
    %202 = vector.extract_strided_slice %192 {offsets = [0, 128], sizes = [1, 128], strides = [1, 1]} : vector<1x384xf32> to vector<1x128xf32>
    %203 = arith.addf %201, %202 : vector<1x128xf32>
    %204 = arith.negf %203 : vector<1x128xf32>
    %205 = math.exp %204 : vector<1x128xf32>
    %cst_104 = arith.constant 1.000000e+00 : f32
    %206 = vector.broadcast %cst_104 : f32 to vector<1x128xf32>
    %207 = arith.addf %206, %205 : vector<1x128xf32>
    %208 = arith.divf %206, %207 : vector<1x128xf32>
    %209 = vector.extract_strided_slice %188 {offsets = [0, 256], sizes = [1, 128], strides = [1, 1]} : vector<1x384xf32> to vector<1x128xf32>
    %210 = vector.extract_strided_slice %192 {offsets = [0, 256], sizes = [1, 128], strides = [1, 1]} : vector<1x384xf32> to vector<1x128xf32>
    %211 = arith.mulf %200, %210 : vector<1x128xf32>
    %212 = arith.addf %209, %211 : vector<1x128xf32>
    %213 = math.tanh %212 : vector<1x128xf32>
    %cst_105 = arith.constant 1.000000e+00 : f32
    %214 = vector.broadcast %cst_105 : f32 to vector<1x128xf32>
    %215 = arith.subf %214, %208 : vector<1x128xf32>
    %216 = arith.mulf %215, %213 : vector<1x128xf32>
    %217 = arith.mulf %208, %186 : vector<1x128xf32>
    %218 = arith.addf %216, %217 : vector<1x128xf32>
    %c4_106 = arith.constant 4 : index
    %c0_107 = arith.constant 0 : index
    %219 = vector.load %arg13[%c4_106, %c0_107] : memref<8x128xf32, #tpu.memory_space<vmem>>, vector<1x128xf32>
    tpu.vector_store %arg13[%c4_106, %c0_107], %218 {strides = array<i32>} : memref<8x128xf32, #tpu.memory_space<vmem>>, vector<1x128xf32>,
    %c5_108 = arith.constant 5 : index
    %c0_109 = arith.constant 0 : index
    %220 = vector.load %arg12[%c5_108, %c0_109] : memref<8x384xf32, #tpu.memory_space<vmem>>, vector<1x384xf32>
    %c0_110 = arith.constant 0 : index
    %c0_111 = arith.constant 0 : index
    %221 = vector.load %arg5[%c0_110, %c0_111] : memref<128x384xf32, #tpu.memory_space<vmem>>, vector<128x384xf32>
    %cst_112 = arith.constant dense<0.000000e+00> : vector<1x384xf32>
    %222 = tpu.matmul %218, %221, %cst_112 {dimension_numbers = #tpu.dot_dimension_numbers<[1], [0], [0], [1], [0, 0, 1, 1], [], []>} : vector<1x128xf32>, vector<128x384xf32>, vector<1x384xf32> -> vector<1x384xf32>
    %c0_113 = arith.constant 0 : index
    %c0_114 = arith.constant 0 : index
    %223 = vector.load %arg6[%c0_113, %c0_114] : memref<1x384xf32, #tpu.memory_space<vmem>>, vector<1x384xf32>
    %224 = arith.addf %222, %223 : vector<1x384xf32>
    %225 = vector.extract_strided_slice %220 {offsets = [0, 0], sizes = [1, 128], strides = [1, 1]} : vector<1x384xf32> to vector<1x128xf32>
    %226 = vector.extract_strided_slice %224 {offsets = [0, 0], sizes = [1, 128], strides = [1, 1]} : vector<1x384xf32> to vector<1x128xf32>
    %227 = arith.addf %225, %226 : vector<1x128xf32>
    %228 = arith.negf %227 : vector<1x128xf32>
    %229 = math.exp %228 : vector<1x128xf32>
    %cst_115 = arith.constant 1.000000e+00 : f32
    %230 = vector.broadcast %cst_115 : f32 to vector<1x128xf32>
    %231 = arith.addf %230, %229 : vector<1x128xf32>
    %232 = arith.divf %230, %231 : vector<1x128xf32>
    %233 = vector.extract_strided_slice %220 {offsets = [0, 128], sizes = [1, 128], strides = [1, 1]} : vector<1x384xf32> to vector<1x128xf32>
    %234 = vector.extract_strided_slice %224 {offsets = [0, 128], sizes = [1, 128], strides = [1, 1]} : vector<1x384xf32> to vector<1x128xf32>
    %235 = arith.addf %233, %234 : vector<1x128xf32>
    %236 = arith.negf %235 : vector<1x128xf32>
    %237 = math.exp %236 : vector<1x128xf32>
    %cst_116 = arith.constant 1.000000e+00 : f32
    %238 = vector.broadcast %cst_116 : f32 to vector<1x128xf32>
    %239 = arith.addf %238, %237 : vector<1x128xf32>
    %240 = arith.divf %238, %239 : vector<1x128xf32>
    %241 = vector.extract_strided_slice %220 {offsets = [0, 256], sizes = [1, 128], strides = [1, 1]} : vector<1x384xf32> to vector<1x128xf32>
    %242 = vector.extract_strided_slice %224 {offsets = [0, 256], sizes = [1, 128], strides = [1, 1]} : vector<1x384xf32> to vector<1x128xf32>
    %243 = arith.mulf %232, %242 : vector<1x128xf32>
    %244 = arith.addf %241, %243 : vector<1x128xf32>
    %245 = math.tanh %244 : vector<1x128xf32>
    %cst_117 = arith.constant 1.000000e+00 : f32
    %246 = vector.broadcast %cst_117 : f32 to vector<1x128xf32>
    %247 = arith.subf %246, %240 : vector<1x128xf32>
    %248 = arith.mulf %247, %245 : vector<1x128xf32>
    %249 = arith.mulf %240, %218 : vector<1x128xf32>
    %250 = arith.addf %248, %249 : vector<1x128xf32>
    %c5_118 = arith.constant 5 : index
    %c0_119 = arith.constant 0 : index
    %251 = vector.load %arg13[%c5_118, %c0_119] : memref<8x128xf32, #tpu.memory_space<vmem>>, vector<1x128xf32>
    tpu.vector_store %arg13[%c5_118, %c0_119], %250 {strides = array<i32>} : memref<8x128xf32, #tpu.memory_space<vmem>>, vector<1x128xf32>,
    %c6_120 = arith.constant 6 : index
    %c0_121 = arith.constant 0 : index
    %252 = vector.load %arg12[%c6_120, %c0_121] : memref<8x384xf32, #tpu.memory_space<vmem>>, vector<1x384xf32>
    %c0_122 = arith.constant 0 : index
    %c0_123 = arith.constant 0 : index
    %253 = vector.load %arg5[%c0_122, %c0_123] : memref<128x384xf32, #tpu.memory_space<vmem>>, vector<128x384xf32>
    %cst_124 = arith.constant dense<0.000000e+00> : vector<1x384xf32>
    %254 = tpu.matmul %250, %253, %cst_124 {dimension_numbers = #tpu.dot_dimension_numbers<[1], [0], [0], [1], [0, 0, 1, 1], [], []>} : vector<1x128xf32>, vector<128x384xf32>, vector<1x384xf32> -> vector<1x384xf32>
    %c0_125 = arith.constant 0 : index
    %c0_126 = arith.constant 0 : index
    %255 = vector.load %arg6[%c0_125, %c0_126] : memref<1x384xf32, #tpu.memory_space<vmem>>, vector<1x384xf32>
    %256 = arith.addf %254, %255 : vector<1x384xf32>
    %257 = vector.extract_strided_slice %252 {offsets = [0, 0], sizes = [1, 128], strides = [1, 1]} : vector<1x384xf32> to vector<1x128xf32>
    %258 = vector.extract_strided_slice %256 {offsets = [0, 0], sizes = [1, 128], strides = [1, 1]} : vector<1x384xf32> to vector<1x128xf32>
    %259 = arith.addf %257, %258 : vector<1x128xf32>
    %260 = arith.negf %259 : vector<1x128xf32>
    %261 = math.exp %260 : vector<1x128xf32>
    %cst_127 = arith.constant 1.000000e+00 : f32
    %262 = vector.broadcast %cst_127 : f32 to vector<1x128xf32>
    %263 = arith.addf %262, %261 : vector<1x128xf32>
    %264 = arith.divf %262, %263 : vector<1x128xf32>
    %265 = vector.extract_strided_slice %252 {offsets = [0, 128], sizes = [1, 128], strides = [1, 1]} : vector<1x384xf32> to vector<1x128xf32>
    %266 = vector.extract_strided_slice %256 {offsets = [0, 128], sizes = [1, 128], strides = [1, 1]} : vector<1x384xf32> to vector<1x128xf32>
    %267 = arith.addf %265, %266 : vector<1x128xf32>
    %268 = arith.negf %267 : vector<1x128xf32>
    %269 = math.exp %268 : vector<1x128xf32>
    %cst_128 = arith.constant 1.000000e+00 : f32
    %270 = vector.broadcast %cst_128 : f32 to vector<1x128xf32>
    %271 = arith.addf %270, %269 : vector<1x128xf32>
    %272 = arith.divf %270, %271 : vector<1x128xf32>
    %273 = vector.extract_strided_slice %252 {offsets = [0, 256], sizes = [1, 128], strides = [1, 1]} : vector<1x384xf32> to vector<1x128xf32>
    %274 = vector.extract_strided_slice %256 {offsets = [0, 256], sizes = [1, 128], strides = [1, 1]} : vector<1x384xf32> to vector<1x128xf32>
    %275 = arith.mulf %264, %274 : vector<1x128xf32>
    %276 = arith.addf %273, %275 : vector<1x128xf32>
    %277 = math.tanh %276 : vector<1x128xf32>
    %cst_129 = arith.constant 1.000000e+00 : f32
    %278 = vector.broadcast %cst_129 : f32 to vector<1x128xf32>
    %279 = arith.subf %278, %272 : vector<1x128xf32>
    %280 = arith.mulf %279, %277 : vector<1x128xf32>
    %281 = arith.mulf %272, %250 : vector<1x128xf32>
    %282 = arith.addf %280, %281 : vector<1x128xf32>
    %c6_130 = arith.constant 6 : index
    %c0_131 = arith.constant 0 : index
    %283 = vector.load %arg13[%c6_130, %c0_131] : memref<8x128xf32, #tpu.memory_space<vmem>>, vector<1x128xf32>
    tpu.vector_store %arg13[%c6_130, %c0_131], %282 {strides = array<i32>} : memref<8x128xf32, #tpu.memory_space<vmem>>, vector<1x128xf32>,
    %c7_132 = arith.constant 7 : index
    %c0_133 = arith.constant 0 : index
    %284 = vector.load %arg12[%c7_132, %c0_133] : memref<8x384xf32, #tpu.memory_space<vmem>>, vector<1x384xf32>
    %c0_134 = arith.constant 0 : index
    %c0_135 = arith.constant 0 : index
    %285 = vector.load %arg5[%c0_134, %c0_135] : memref<128x384xf32, #tpu.memory_space<vmem>>, vector<128x384xf32>
    %cst_136 = arith.constant dense<0.000000e+00> : vector<1x384xf32>
    %286 = tpu.matmul %282, %285, %cst_136 {dimension_numbers = #tpu.dot_dimension_numbers<[1], [0], [0], [1], [0, 0, 1, 1], [], []>} : vector<1x128xf32>, vector<128x384xf32>, vector<1x384xf32> -> vector<1x384xf32>
    %c0_137 = arith.constant 0 : index
    %c0_138 = arith.constant 0 : index
    %287 = vector.load %arg6[%c0_137, %c0_138] : memref<1x384xf32, #tpu.memory_space<vmem>>, vector<1x384xf32>
    %288 = arith.addf %286, %287 : vector<1x384xf32>
    %289 = vector.extract_strided_slice %284 {offsets = [0, 0], sizes = [1, 128], strides = [1, 1]} : vector<1x384xf32> to vector<1x128xf32>
    %290 = vector.extract_strided_slice %288 {offsets = [0, 0], sizes = [1, 128], strides = [1, 1]} : vector<1x384xf32> to vector<1x128xf32>
    %291 = arith.addf %289, %290 : vector<1x128xf32>
    %292 = arith.negf %291 : vector<1x128xf32>
    %293 = math.exp %292 : vector<1x128xf32>
    %cst_139 = arith.constant 1.000000e+00 : f32
    %294 = vector.broadcast %cst_139 : f32 to vector<1x128xf32>
    %295 = arith.addf %294, %293 : vector<1x128xf32>
    %296 = arith.divf %294, %295 : vector<1x128xf32>
    %297 = vector.extract_strided_slice %284 {offsets = [0, 128], sizes = [1, 128], strides = [1, 1]} : vector<1x384xf32> to vector<1x128xf32>
    %298 = vector.extract_strided_slice %288 {offsets = [0, 128], sizes = [1, 128], strides = [1, 1]} : vector<1x384xf32> to vector<1x128xf32>
    %299 = arith.addf %297, %298 : vector<1x128xf32>
    %300 = arith.negf %299 : vector<1x128xf32>
    %301 = math.exp %300 : vector<1x128xf32>
    %cst_140 = arith.constant 1.000000e+00 : f32
    %302 = vector.broadcast %cst_140 : f32 to vector<1x128xf32>
    %303 = arith.addf %302, %301 : vector<1x128xf32>
    %304 = arith.divf %302, %303 : vector<1x128xf32>
    %305 = vector.extract_strided_slice %284 {offsets = [0, 256], sizes = [1, 128], strides = [1, 1]} : vector<1x384xf32> to vector<1x128xf32>
    %306 = vector.extract_strided_slice %288 {offsets = [0, 256], sizes = [1, 128], strides = [1, 1]} : vector<1x384xf32> to vector<1x128xf32>
    %307 = arith.mulf %296, %306 : vector<1x128xf32>
    %308 = arith.addf %305, %307 : vector<1x128xf32>
    %309 = math.tanh %308 : vector<1x128xf32>
    %cst_141 = arith.constant 1.000000e+00 : f32
    %310 = vector.broadcast %cst_141 : f32 to vector<1x128xf32>
    %311 = arith.subf %310, %304 : vector<1x128xf32>
    %312 = arith.mulf %311, %309 : vector<1x128xf32>
    %313 = arith.mulf %304, %282 : vector<1x128xf32>
    %314 = arith.addf %312, %313 : vector<1x128xf32>
    %c7_142 = arith.constant 7 : index
    %c0_143 = arith.constant 0 : index
    %315 = vector.load %arg13[%c7_142, %c0_143] : memref<8x128xf32, #tpu.memory_space<vmem>>, vector<1x128xf32>
    tpu.vector_store %arg13[%c7_142, %c0_143], %314 {strides = array<i32>} : memref<8x128xf32, #tpu.memory_space<vmem>>, vector<1x128xf32>,
    %c0_144 = arith.constant 0 : index
    %c0_145 = arith.constant 0 : index
    %316 = vector.load %arg10[%c0_144, %c0_145] : memref<1x128xf32, #tpu.memory_space<vmem>>, vector<1x128xf32>
    tpu.vector_store %arg10[%c0_144, %c0_145], %314 {strides = array<i32>} : memref<1x128xf32, #tpu.memory_space<vmem>>, vector<1x128xf32>,
    %c0_146 = arith.constant 0 : index
    %c0_147 = arith.constant 0 : index
    %317 = vector.load %arg13[%c0_146, %c0_147] : memref<8x128xf32, #tpu.memory_space<vmem>>, vector<8x128xf32>
    %c0_148 = arith.constant 0 : index
    %c0_149 = arith.constant 0 : index
    %318 = vector.load %arg7[%c0_148, %c0_149] : memref<128x128xf32, #tpu.memory_space<vmem>>, vector<128x128xf32>
    %cst_150 = arith.constant dense<0.000000e+00> : vector<8x128xf32>
    %319 = tpu.matmul %317, %318, %cst_150 {dimension_numbers = #tpu.dot_dimension_numbers<[1], [0], [0], [1], [0, 0, 1, 1], [], []>} : vector<8x128xf32>, vector<128x128xf32>, vector<8x128xf32> -> vector<8x128xf32>
    %c0_151 = arith.constant 0 : index
    %c0_152 = arith.constant 0 : index
    %320 = vector.load %arg8[%c0_151, %c0_152] : memref<1x128xf32, #tpu.memory_space<vmem>>, vector<1x128xf32>
    %321 = vector.broadcast %320 : vector<1x128xf32> to vector<8x128xf32>
    %322 = arith.addf %319, %321 : vector<8x128xf32>
    %cst_153 = arith.constant dense<0xFF800000> : vector<8xf32>
    %323 = vector.multi_reduction <maximumf>, %322, %cst_153 [1] : vector<8x128xf32> to vector<8xf32>
    %324 = vector.shape_cast %323 : vector<8xf32> to vector<8x1xf32>
    %325 = vector.broadcast %324 : vector<8x1xf32> to vector<8x128xf32>
    %326 = arith.subf %322, %325 : vector<8x128xf32>
    %327 = math.exp %326 : vector<8x128xf32>
    %cst_154 = arith.constant dense<0.000000e+00> : vector<8xf32>
    %328 = vector.multi_reduction <add>, %327, %cst_154 [1] : vector<8x128xf32> to vector<8xf32>
    %329 = vector.shape_cast %328 : vector<8xf32> to vector<8x1xf32>
    %330 = vector.broadcast %324 : vector<8x1xf32> to vector<8x128xf32>
    %331 = arith.subf %322, %330 : vector<8x128xf32>
    %332 = math.log %329 : vector<8x1xf32>
    %333 = vector.broadcast %332 : vector<8x1xf32> to vector<8x128xf32>
    %334 = arith.subf %331, %333 : vector<8x128xf32>
    %c0_155 = arith.constant 0 : index
    %c0_156 = arith.constant 0 : index
    %335 = vector.load %arg9[%c0_155, %c0_156] : memref<8x128xf32, #tpu.memory_space<vmem>>, vector<8x128xf32>
    tpu.vector_store %arg9[%c0_155, %c0_156], %334 {strides = array<i32>} : memref<8x128xf32, #tpu.memory_space<vmem>>, vector<8x128xf32>,
    return
  }
}

</mosaic_0001>

<bundles_post_ra>
// kernel: tpu_custom_call.1
= control target key start
LH: loop header
LB: loop body
LE: loop exit
PB: predicated region body
PF: predicated region fallthrough
CT: control target
= control target key end

     0   :  { %16 = vsyncpa [#allocation8], 0  ;;  %s4405_s0 = inlined_call_operand.hbm [shape: s32[8], index: 0, kind: input, shape index: {}]   ;;  %s4406_s1 = inlined_call_operand.hbm [shape: f32[40,128], index: 1, kind: input, shape index: {}]   ;;  %s4407_s2 = inlined_call_operand.vmem [shape: f32[1,128], index: 2, kind: input, shape index: {}]   ;;  %s4408_s3 = inlined_call_operand.hbm [shape: f32[128,384], index: 3, kind: input, shape index: {}]   ;;  %s4409_s4 = inlined_call_operand.vmem [shape: f32[1,384], index: 4, kind: input, shape index: {}]   ;;  %s4410_s5 = inlined_call_operand.hbm [shape: f32[128,384], index: 5, kind: input, shape index: {}]   ;;  %s4411_s6 = inlined_call_operand.vmem [shape: f32[1,384], index: 6, kind: input, shape index: {}]   ;;  %s4412_s7 = inlined_call_operand.hbm [shape: f32[128,128], index: 7, kind: input, shape index: {}]   ;;  %s4413_s8 = inlined_call_operand.vmem [shape: f32[1,128], index: 8, kind: input, shape index: {}]   ;;  %s4414_s9 = inlined_call_operand.hbm [shape: f32[8,128], index: 9, kind: output, shape index: {0}]   ;;  %s4415_s10 = inlined_call_operand.hbm [shape: f32[1,128], index: 10, kind: output, shape index: {1}]  }
   0x1   :  { %17 = vsyncpa [#allocation6], 0 }
   0x2   :  { %18 = vsyncpa [#allocation11], 0 }
   0x3   :  { %19 = vsyncpa [#allocation14], 0 }
   0x4   :  { %20 = vsyncpa [#allocation7], 0 }
   0x5   :  { %21 = vsyncpa [#allocation17], 0  ;;  %s3704_s13 = smov [#allocation10]   ;;  %s3550_s17 = scalar_lea.hbm %s4408_s3, 6144 }
   0x6   :  { %s49_s14 = sshll.u32 %s3704_s13, 4  ;;  %p3551_p0 = scmp.ne.s32.totalorder %s4408_s3, %s3550_s17  ;;  %s50_s14 = int_to_ptr.vmem [resolvable:$true] %s49_s14 }
   0x7   :  { %p3554_p1 = scmp.lt.u32.totalorder %s3550_s17, %s4408_s3 }
   0x9   :  { %p3556_p2 = pnand %p3554_p1, %p3551_p0 }
   0xb   :  { %3559 = shalt.err (!%p3556_p2)
}
   0xc   :  { %s3560_s22 = scalar_lea.vmem %s50_s14, 6144  ;;  %p3565_p4 = scmp.lt.s32.totalorder %s50_s14, %s50_s14 }
   0xd   :  { %p3561_p3 = scmp.ne.s32.totalorder %s50_s14, %s3560_s22  ;;  %p3566_p5 = scmp.lt.s32.totalorder %s3560_s22, %s3560_s22 }
   0xf   :  { %p3567_p6 = por %p3566_p5, %p3565_p4 }
  0x11   :  { %p3568_p7 = pnand %p3567_p6, %p3561_p3 }
  0x13   :  { %3571 = shalt.err (!%p3568_p7)
}
  0x14   :  { %s3705_s23 = smov 384   ;;  %s3706_s24 = smov 24  }
  0x15   :  { %55 = dma.hbm_to_vmem [thread:$0]  %s4408_s3, 6144, %s50_s14, [#allocation11], %s3705_s23, %s3705_s23, %s3706_s24  }
  0x16   :  { %s3572_s29 = scalar_lea.hbm %s4405_s0, 16 }
  0x17   :  { %p3573_p8 = scmp.ne.s32.totalorder %s4405_s0, %s3572_s29  ;;  %p3576_p9 = scmp.lt.u32.totalorder %s3572_s29, %s4405_s0 }
  0x19   :  { %p3578_p10 = pnand %p3576_p9, %p3573_p8 }
  0x1b   :  { %3581 = shalt.err (!%p3578_p10)
}
  0x1c   :  { %s3707_s15 = smov [#allocation5]   ;;  %s3708_s3 = smov [#allocation9]  }
  0x1d   :  { %29 = dma.hbm_to_smem %s4405_s0, 16, %s3707_s15, [#allocation8]  }
  0x1e   :  { %s35_s14 = sshll.u32 %s3708_s3, 4  ;;  %s3582_s20 = scalar_lea.hbm %s4406_s1, 640  ;;  %s36_s14 = int_to_ptr.vmem [resolvable:$true] %s35_s14 }
  0x1f   :  { %p3583_p11 = scmp.ne.s32.totalorder %s4406_s1, %s3582_s20  ;;  %p3586_p12 = scmp.lt.u32.totalorder %s3582_s20, %s4406_s1 }
  0x21   :  { %p3588_p13 = pnand %p3586_p12, %p3583_p11 }
  0x23   :  { %3591 = shalt.err (!%p3588_p13)
}
  0x24   :  { %s3592_s27 = scalar_lea.vmem %s36_s14, 640  ;;  %p3597_p1 = scmp.lt.s32.totalorder %s36_s14, %s36_s14 }
  0x25   :  { %p3593_p0 = scmp.ne.s32.totalorder %s36_s14, %s3592_s27  ;;  %p3598_p2 = scmp.lt.s32.totalorder %s3592_s27, %s3592_s27 }
  0x27   :  { %p3599_p3 = por %p3598_p2, %p3597_p1 }
  0x29   :  { %p3600_p4 = pnand %p3599_p3, %p3593_p0 }
  0x2b   :  { %3603 = shalt.err (!%p3600_p4)
}
  0x2c   :  { %s3709_s0 = smov 128   ;;  %s3710_s28 = smov 8  }
  0x2d   :  { %41 = dma.hbm_to_vmem [thread:$0]  %s4406_s1, 640, %s36_s14, [#allocation6], %s3709_s0, %s3709_s0, %s3710_s28  }
  0x2e   :  { %s3711_s11 = smov [#allocation12]   ;;  %s3712_s13 = smov [#allocation13]  }
  0x2f   :  { %s63_s12 = sshll.u32 %s3711_s11, 4  ;;  %s77_s15 = sshll.u32 %s3712_s13, 4  ;;  %s64_s12 = int_to_ptr.vmem [resolvable:$true] %s63_s12  ;;  %s78_s15 = int_to_ptr.vmem [resolvable:$true] %s77_s15 }
  0x30   :  { %s3604_s3 = scalar_lea.hbm %s4410_s5, 6144 }
  0x31   :  { %p3605_p5 = scmp.ne.s32.totalorder %s4410_s5, %s3604_s3  ;;  %p3608_p6 = scmp.lt.u32.totalorder %s3604_s3, %s4410_s5 }
  0x33   :  { %p3610_p7 = pnand %p3608_p6, %p3605_p5 }
  0x35   :  { %3613 = shalt.err (!%p3610_p7)
}
  0x36   :  { %s3614_s1 = scalar_lea.vmem %s64_s12, 6144  ;;  %p3619_p9 = scmp.lt.s32.totalorder %s64_s12, %s64_s12 }
  0x37   :  { %p3615_p8 = scmp.ne.s32.totalorder %s64_s12, %s3614_s1  ;;  %p3620_p10 = scmp.lt.s32.totalorder %s3614_s1, %s3614_s1 }
  0x39   :  { %p3621_p11 = por %p3620_p10, %p3619_p9 }
  0x3b   :  { %p3622_p12 = pnand %p3621_p11, %p3615_p8 }
  0x3d   :  { %3625 = shalt.err (!%p3622_p12)
}
  0x3e   :  { %69 = dma.hbm_to_vmem [thread:$0]  %s4410_s5, 6144, %s64_s12, [#allocation11], %s3705_s23, %s3705_s23, %s3706_s24  }
  0x3f   :  { %s3626_s27 = scalar_lea.hbm %s4412_s7, 2048 }
  0x40   :  { %p3627_p13 = scmp.ne.s32.totalorder %s4412_s7, %s3626_s27  ;;  %p3630_p0 = scmp.lt.u32.totalorder %s3626_s27, %s4412_s7 }
  0x42   :  { %p3632_p1 = pnand %p3630_p0, %p3627_p13 }
  0x44   :  { %3635 = shalt.err (!%p3632_p1)
}
  0x45   :  { %s3636_s16 = scalar_lea.vmem %s78_s15, 2048  ;;  %p3641_p3 = scmp.lt.s32.totalorder %s78_s15, %s78_s15 }
  0x46   :  { %p3637_p2 = scmp.ne.s32.totalorder %s78_s15, %s3636_s16  ;;  %p3642_p4 = scmp.lt.s32.totalorder %s3636_s16, %s3636_s16 }
  0x48   :  { %p3643_p5 = por %p3642_p4, %p3641_p3 }
  0x4a   :  { %p3644_p6 = pnand %p3643_p5, %p3637_p2 }
  0x4c   :  { %3647 = shalt.err (!%p3644_p6)
}
  0x4d   :  { %83 = dma.hbm_to_vmem [thread:$0]  %s4412_s7, 2048, %s78_s15, [#allocation14], %s3709_s0, %s3709_s0, %s3710_s28  }
  0x4e   :  { %3692 = dma.done.wait [#allocation8], 16  }
  0x4f   :  { %3693 = vsyncadd [#allocation8], 4294967280 }
  0x50   :  { %3694 = dma.done.wait [#allocation6], 640  }
  0x51   :  { %3695 = vsyncadd [#allocation6], 4294966656 }
  0x52   :  { %3696 = dma.done.wait [#allocation11], 12288  }
  0x53   :  { %3697 = vsyncadd [#allocation11], 4294955008 }
  0x54   :  { %3698 = dma.done.wait [#allocation14], 2048  }
  0x55   :  { %3699 = vsyncadd [#allocation14], 4294965248 }
  0x56   :  { %101 = sfence }
  0x57   :  { %v146_v0 = vld [vmem:[#allocation10 + $0x8] sm:$0xff]  ;;  %v149_v1 = vld [vmem:[#allocation10 + $0x20] sm:$0xff]  ;;  %v148_v4 = vld [vmem:[#allocation10 + $0x18] sm:$0xff]  ;;  %v3713_v5 = vmov 0.0|0.0   ;;  %v3714_v8 = vmov 0.0   ;;  %s3849_s7 = sld [smem:[#allocation5]] }
  0x58   :  { %v145_v2 = vld [vmem:[#allocation10] sm:$0xff]  ;;  %v2924_v3 = vpack.c.bf16 %v149_v1, %v146_v0  ;;  %2956 = vmatprep.subr.bf16.mxu1 %v3713_v5  ;;  %v147_v6 = vld [vmem:[#allocation10 + $0x10] sm:$0xff]  ;;  %v150_v7 = vld [vmem:[#allocation10 + $0x28] sm:$0xff]  ;;  %274 = vmatprep.mubr.f32.mxu0 %v3714_v8  ;;  %102 = vst [vmem:[#allocation2] sm:$0xff] %v3714_v8  ;;  %vm3715_vm0 = vmmov 0   ;;  %s3853_s24 = sld [smem:[#allocation5 + $0x1]] }
  0x59   :  { %103 = vst [vmem:[#allocation4] sm:$0xff] %v3714_v8  ;;  %v2926_v9 = vpack.c.bf16 %v148_v4, %v145_v2  ;;  %v2957_v10 = vpack.c.bf16 %v150_v7, %v147_v6  ;;  %v152_v11 = vld [vmem:[#allocation10 + $0x38] sm:$0xff]  ;;  %v155_v12 = vld [vmem:[#allocation10 + $0x50] sm:$0xff]  ;;  %2606 = vmatprep.mubr.msk.f32.mxu1 %vm3715_vm0, %v3714_v8  ;;  %v154_v15 = vld [vmem:[#allocation10 + $0x48] sm:$0xff]  ;;  %s3855_s0 = sld [smem:[#allocation5 + $0x2]]  ;;  %s3858_s28 = sld [smem:[#allocation5 + $0x3]] }
  0x5a   :  { %v151_v13 = vld [vmem:[#allocation10 + $0x30] sm:$0xff]  ;;  %2925 = vmatprep.subr.bf16.mxu0 %v2924_v3  ;;  %v2928_v14 = vpack.c.bf16 %v155_v12, %v152_v11  ;;  %v153_v16 = vld [vmem:[#allocation10 + $0x40] sm:$0xff]  ;;  %v156_v17 = vld [vmem:[#allocation10 + $0x58] sm:$0xff]  ;;  %s3860_s12 = sld [smem:[#allocation5 + $0x4]]  ;;  %s3862_s15 = sld [smem:[#allocation5 + $0x5]] }
  0x5b   :  { %2927 = vmatpush1.bf16.msra.mxu0 %v2926_v9  ;;  %2958 = vmatpush3.bf16.msra.mxu1 %v2957_v10  ;;  %v2930_v18 = vpack.c.bf16 %v154_v15, %v151_v13  ;;  %v2960_v19 = vpack.c.bf16 %v156_v17, %v153_v16  ;;  %v158_v20 = vld [vmem:[#allocation10 + $0x68] sm:$0xff]  ;;  %v161_v21 = vld [vmem:[#allocation10 + $0x80] sm:$0xff]  ;;  %v160_v24 = vld [vmem:[#allocation10 + $0x78] sm:$0xff]  ;;  %s3864_s17 = sld [smem:[#allocation5 + $0x6]]  ;;  %s3866_s3 = sld [smem:[#allocation5 + $0x7]] }
  0x5c   :  { %v157_v22 = vld [vmem:[#allocation10 + $0x60] sm:$0xff]  ;;  %2929 = vmatprep.subr.bf16.mxu0 %v2928_v14  ;;  %2959 = vmatprep.subr.bf16.mxu1 %v3713_v5  ;;  %v2932_v23 = vpack.c.bf16 %v161_v21, %v158_v20  ;;  %v159_v25 = vld [vmem:[#allocation10 + $0x70] sm:$0xff]  ;;  %v162_v26 = vld [vmem:[#allocation10 + $0x88] sm:$0xff] }
  0x5d   :  { %v164_v27 = vld [vmem:[#allocation10 + $0x98] sm:$0xff]  ;;  %v167_v28 = vld [vmem:[#allocation10 + $0xb0] sm:$0xff]  ;;  %v2934_v29 = vpack.c.bf16 %v160_v24, %v157_v22  ;;  %v2963_v30 = vpack.c.bf16 %v162_v26, %v159_v25  ;;  %v166_v33 = vld [vmem:[#allocation10 + $0xa8] sm:$0xff]  ;;  %s105_s18 = scalar_lea.vmem [#allocation9], %s3849_s7 }
  0x5e   :  { %v163_v31 = vld [vmem:[#allocation10 + $0x90] sm:$0xff]  ;;  %v2936_v32 = vpack.c.bf16 %v167_v28, %v164_v27  ;;  %v165_v34 = vld [vmem:[#allocation10 + $0xa0] sm:$0xff]  ;;  %v168_v35 = vld [vmem:[#allocation10 + $0xb8] sm:$0xff]  ;;  %s110_s19 = scalar_lea.vmem [#allocation9], %s3853_s24 }
  0x5f   :  { %2931 = vmatpush1.bf16.msra.mxu0 %v2930_v18  ;;  %2961 = vmatpush3.bf16.msra.mxu1 %v2960_v19  ;;  %v170_v36 = vld [vmem:[#allocation10 + $0xc8] sm:$0xff]  ;;  %v173_v37 = vld [vmem:[#allocation10 + $0xe0] sm:$0xff]  ;;  %v2938_v38 = vpack.c.bf16 %v166_v33, %v163_v31  ;;  %v2966_v39 = vpack.c.bf16 %v168_v35, %v165_v34  ;;  %v172_v42 = vld [vmem:[#allocation10 + $0xd8] sm:$0xff]  ;;  %s115_s20 = scalar_lea.vmem [#allocation9], %s3855_s0  ;;  %s120_s21 = scalar_lea.vmem [#allocation9], %s3858_s28 }
  0x60   :  { %2933 = vmatprep.subr.bf16.mxu0 %v2932_v23  ;;  %2962 = vmatprep.subr.bf16.mxu1 %v3713_v5  ;;  %v169_v40 = vld [vmem:[#allocation10 + $0xc0] sm:$0xff]  ;;  %v2940_v41 = vpack.c.bf16 %v173_v37, %v170_v36  ;;  %v171_v43 = vld [vmem:[#allocation10 + $0xd0] sm:$0xff]  ;;  %v174_v44 = vld [vmem:[#allocation10 + $0xe8] sm:$0xff]  ;;  %s125_s1 = scalar_lea.vmem [#allocation9], %s3860_s12  ;;  %s130_s14 = scalar_lea.vmem [#allocation9], %s3862_s15 }
  0x61   :  { %v176_v45 = vld [vmem:[#allocation10 + $0xf8] sm:$0xff]  ;;  %v179_v46 = vld [vmem:[#allocation10 + $0x110] sm:$0xff]  ;;  %v178_v48 = vld [vmem:[#allocation10 + $0x108] sm:$0xff]  ;;  %v2942_v51 = vpack.c.bf16 %v172_v42, %v169_v40  ;;  %v2969_v52 = vpack.c.bf16 %v174_v44, %v171_v43  ;;  %s135_s22 = scalar_lea.vmem [#allocation9], %s3864_s17  ;;  %s140_s25 = scalar_lea.vmem [#allocation9], %s3866_s3 }
  0x62   :  { %v175_v47 = vld [vmem:[#allocation10 + $0xf0] sm:$0xff]  ;;  %v177_v49 = vld [vmem:[#allocation10 + $0x100] sm:$0xff]  ;;  %v180_v50 = vld [vmem:[#allocation10 + $0x118] sm:$0xff]  ;;  %v2944_v56 = vpack.c.bf16 %v179_v46, %v176_v45 }
  0x63   :  { %2935 = vmatpush1.bf16.msra.mxu0 %v2934_v29  ;;  %2964 = vmatpush3.bf16.msra.mxu1 %v2963_v30  ;;  %v106_v53 = vld [vmem:[%s105_s18] sm:$0x1]  ;;  %v182_v57 = vld [vmem:[#allocation10 + $0x128] sm:$0xff]  ;;  %v2946_v7 = vpack.c.bf16 %v178_v48, %v175_v47  ;;  %v2972_v9 = vpack.c.bf16 %v180_v50, %v177_v49  ;;  %v184_v14 = vld [vmem:[#allocation10 + $0x138] sm:$0xff] }
  0x64   :  { %2937 = vmatprep.subr.bf16.mxu0 %v2936_v32  ;;  %2965 = vmatprep.subr.bf16.mxu1 %v3713_v5  ;;  %v111_v54 = vld [vmem:[%s110_s19] sm:$0x1]  ;;  %v107_v58 = vmax.f32 %v106_v53, 0.0  ;;  %v183_v15 = vld [vmem:[#allocation10 + $0x130] sm:$0xff]  ;;  %v186_v16 = vld [vmem:[#allocation10 + $0x148] sm:$0xff] }
  0x65   :  { %v116_v55 = vld [vmem:[%s115_s20] sm:$0x1]  ;;  %v112_v59 = vmax.f32 %v111_v54, 0.0  ;;  %v188_v17 = vld [vmem:[#allocation10 + $0x158] sm:$0xff]  ;;  %v191_v18 = vld [vmem:[#allocation10 + $0x170] sm:$0xff]  ;;  %v2975_v20 = vpack.c.bf16 %v186_v16, %v183_v15  ;;  %s3716_s20 = smov [#allocation16]  }
  0x66   :  { %v117_v60 = vmax.f32 %v116_v55, 0.0  ;;  %v121_v61 = vld [vmem:[%s120_s21] sm:$0x1]  ;;  %108 = vst [vmem:[#allocation2] sm:$0x1] %v107_v58  ;;  %v187_v21 = vld [vmem:[#allocation10 + $0x150] sm:$0xff]  ;;  %v2952_v22 = vpack.c.bf16 %v191_v18, %v188_v17 }
  0x67   :  { %2939 = vmatpush1.bf16.msra.mxu0 %v2938_v38  ;;  %2967 = vmatpush3.bf16.msra.mxu1 %v2966_v39  ;;  %v185_v62 = vld [vmem:[#allocation10 + $0x140] sm:$0xff]  ;;  %v122_v63 = vmax.f32 %v121_v61, 0.0  ;;  %113 = vst [vmem:[#allocation2 + $0x1] sm:$0x1] %v112_v59  ;;  %v190_v23 = vld [vmem:[#allocation10 + $0x168] sm:$0xff]  ;;  %v192_v25 = vld [vmem:[#allocation10 + $0x178] sm:$0xff] }
  0x68   :  { %2941 = vmatprep.subr.bf16.mxu0 %v2940_v41  ;;  %2968 = vmatprep.subr.bf16.mxu1 %v3713_v5  ;;  %v126_v0 = vld [vmem:[%s125_s1] sm:$0x1]  ;;  %118 = vst [vmem:[#allocation2 + $0x2] sm:$0x1] %v117_v60  ;;  %v2948_v13 = vpack.c.bf16 %v185_v62, %v182_v57  ;;  %v357_v26 = vld [vmem:[#allocation12 + $0x8] sm:$0xff]  ;;  %v2954_v28 = vpack.c.bf16 %v190_v23, %v187_v21  ;;  %v359_v32 = vld [vmem:[#allocation12 + $0x18] sm:$0xff] }
  0x69   :  { %v131_v1 = vld [vmem:[%s130_s14] sm:$0x1]  ;;  %v127_v2 = vmax.f32 %v126_v0, 0.0  ;;  %123 = vst [vmem:[#allocation2 + $0x3] sm:$0x1] %v122_v63  ;;  %v358_v33 = vld [vmem:[#allocation12 + $0x10] sm:$0xff] }
  0x6a   :  { %v132_v3 = vmax.f32 %v131_v1, 0.0  ;;  %v136_v4 = vld [vmem:[%s135_s22] sm:$0x1]  ;;  %v363_v34 = vld [vmem:[#allocation12 + $0x38] sm:$0xff]  ;;  %v366_v35 = vld [vmem:[#allocation12 + $0x50] sm:$0xff]  ;;  %s2356_s21 = sshll.u32 %s3716_s20, 4  ;;  %s2357_s21 = int_to_ptr.vmem [resolvable:$true] %s2356_s21 }
  0x6b   :  { %v141_v6 = vld [vmem:[%s140_s25] sm:$0x1]  ;;  %2943 = vmatpush1.bf16.msra.mxu0 %v2942_v51  ;;  %2970 = vmatpush3.bf16.msra.mxu1 %v2969_v52  ;;  %v137_v11 = vmax.f32 %v136_v4, 0.0  ;;  %128 = vst [vmem:[#allocation2 + $0x4] sm:$0x1] %v127_v2  ;;  %v361_v36 = vld [vmem:[#allocation12 + $0x28] sm:$0xff]  ;;  %v3889_v41 = vpack.c.bf16 %v366_v35, %v363_v34  ;;  %p3653_p8 = scmp.lt.s32.totalorder %s2357_s21, %s2357_s21 }
  0x6c   :  { %v181_v10 = vld [vmem:[#allocation10 + $0x120] sm:$0xff]  ;;  %v142_v12 = vmax.f32 %v141_v6, 0.0  ;;  %2945 = vmatprep.subr.bf16.mxu0 %v2944_v56  ;;  %2971 = vmatprep.subr.bf16.mxu1 %v3713_v5  ;;  %133 = vst [vmem:[#allocation2 + $0x5] sm:$0x1] %v132_v3  ;;  %v362_v39 = vld [vmem:[#allocation12 + $0x30] sm:$0xff]  ;;  %v3886_v40 = vpack.c.bf16 %v361_v36, %v358_v33  ;;  %v365_v42 = vld [vmem:[#allocation12 + $0x48] sm:$0xff] }
  0x6d   :  { %138 = vst [vmem:[#allocation2 + $0x6] sm:$0x1] %v137_v11  ;;  %v2950_v19 = vpack.c.bf16 %v184_v14, %v181_v10  ;;  %v189_v24 = vld [vmem:[#allocation10 + $0x160] sm:$0xff]  ;;  %v367_v44 = vld [vmem:[#allocation12 + $0x58] sm:$0xff]  ;;  %v369_v45 = vld [vmem:[#allocation12 + $0x68] sm:$0xff]  ;;  %v3893_v47 = vpack.c.bf16 %v365_v42, %v362_v39  ;;  %s3648_s1 = scalar_lea.vmem %s2357_s21, 16 }
  0x6e   :  { %143 = vst [vmem:[#allocation2 + $0x7] sm:$0x1] %v142_v12  ;;  %v360_v27 = vld [vmem:[#allocation12 + $0x20] sm:$0xff]  ;;  %v2978_v29 = vpack.c.bf16 %v192_v25, %v189_v24  ;;  %v371_v51 = vld [vmem:[#allocation12 + $0x78] sm:$0xff]  ;;  %v370_v52 = vld [vmem:[#allocation12 + $0x70] sm:$0xff]  ;;  %p3649_p7 = scmp.ne.s32.totalorder %s2357_s21, %s3648_s1  ;;  %s3652_s14 = scalar_lea.vmem %s2357_s21, 32 }
  0x6f   :  { %2947 = vmatpush1.bf16.msra.mxu0 %v2946_v7  ;;  %2973 = vmatpush3.bf16.msra.mxu1 %v2972_v9  ;;  %v3882_v30 = vpack.c.bf16 %v360_v27, %v357_v26  ;;  %v356_v31 = vld [vmem:[#allocation12] sm:$0xff]  ;;  %v373_v53 = vld [vmem:[#allocation12 + $0x88] sm:$0xff]  ;;  %v375_v54 = vld [vmem:[#allocation12 + $0x98] sm:$0xff]  ;;  %p3654_p9 = scmp.lt.s32.totalorder %s3652_s14, %s3648_s1 }
  0x70   :  { %2949 = vmatprep.subr.bf16.mxu0 %v2948_v13  ;;  %2974 = vmatprep.subr.bf16.mxu1 %v3713_v5  ;;  %v3884_v38 = vpack.c.bf16 %v359_v32, %v356_v31  ;;  %v364_v43 = vld [vmem:[#allocation12 + $0x40] sm:$0xff]  ;;  %v378_v55 = vld [vmem:[#allocation12 + $0xb0] sm:$0xff]  ;;  %v3909_v58 = vpack.c.bf16 %v373_v53, %v370_v52  ;;  %v377_v60 = vld [vmem:[#allocation12 + $0xa8] sm:$0xff] }
  0x71   :  { %v372_v46 = vld [vmem:[#allocation12 + $0x80] sm:$0xff]  ;;  %v3896_v49 = vpack.c.bf16 %v367_v44, %v364_v43  ;;  %v374_v57 = vld [vmem:[#allocation12 + $0x90] sm:$0xff]  ;;  %v3912_v59 = vpack.c.bf16 %v378_v55, %v375_v54  ;;  %v379_v62 = vld [vmem:[#allocation12 + $0xb8] sm:$0xff]  ;;  %v195_v44 = vlaneseq  ;;  %p3655_p10 = por %p3654_p9, %p3653_p8 }
  0x72   :  { %v368_v48 = vld [vmem:[#allocation12 + $0x60] sm:$0xff]  ;;  %v3899_v50 = vpack.c.bf16 %v372_v46, %v369_v45  ;;  %v381_v63 = vld [vmem:[#allocation12 + $0xc8] sm:$0xff]  ;;  %v3916_v1 = vpack.c.bf16 %v377_v60, %v374_v57  ;;  %v383_v6 = vld [vmem:[#allocation12 + $0xd8] sm:$0xff] }
  0x73   :  { %2951 = vmatpush1.bf16.msra.mxu0 %v2950_v19  ;;  %2976 = vmatpush3.bf16.msra.mxu1 %v2975_v20  ;;  %v3906_v56 = vpack.c.bf16 %v371_v51, %v368_v48  ;;  %v376_v61 = vld [vmem:[#allocation12 + $0xa0] sm:$0xff]  ;;  %v382_v7 = vld [vmem:[#allocation12 + $0xd0] sm:$0xff]  ;;  %v385_v9 = vld [vmem:[#allocation12 + $0xe8] sm:$0xff]  ;;  %v196_v45 = vshrl.u32 %v195_v44, 7  ;;  %p3656_p11 = pnand %p3655_p10, %p3649_p7 }
  0x74   :  { %2953 = vmatprep.subr.bf16.mxu0 %v2952_v22  ;;  %2977 = vmatprep.subr.bf16.mxu1 %v3713_v5  ;;  %v384_v0 = vld [vmem:[#allocation12 + $0xe0] sm:$0xff]  ;;  %v3919_v3 = vpack.c.bf16 %v379_v62, %v376_v61  ;;  %v387_v10 = vld [vmem:[#allocation12 + $0xf8] sm:$0xff]  ;;  %v390_v11 = vld [vmem:[#allocation12 + $0x110] sm:$0xff]  ;;  %v3929_v14 = vpack.c.bf16 %v385_v9, %v382_v7 }
  0x75   :  { %v144_v37 = vld [vmem:[#allocation2] sm:$0xff]  ;;  %v380_v2 = vld [vmem:[#allocation12 + $0xc0] sm:$0xff]  ;;  %v3922_v4 = vpack.c.bf16 %v384_v0, %v381_v63  ;;  %v3932_v15 = vpack.c.bf16 %v390_v11, %v387_v10  ;;  %v389_v16 = vld [vmem:[#allocation12 + $0x108] sm:$0xff]  ;;  %v4009_v46 = vsub.s32 0, %v196_v45  ;;  %v4011_v48 = vsub.s32 2, %v196_v45 }
  0x76   :  { %v3926_v12 = vpack.c.bf16 %v383_v6, %v380_v2  ;;  %v386_v13 = vld [vmem:[#allocation12 + $0xf0] sm:$0xff]  ;;  %v388_v17 = vld [vmem:[#allocation12 + $0x100] sm:$0xff]  ;;  %v391_v18 = vld [vmem:[#allocation12 + $0x118] sm:$0xff]  ;;  %v4016_v52 = vsub.s32 1, %v196_v45 }
  0x77   :  { %2955 = vmatpush1.bf16.msra.mxu0 %v2954_v28  ;;  %2979 = vmatpush3.bf16.msra.mxu1 %v2978_v29  ;;  %v393_v19 = vld [vmem:[#allocation12 + $0x128] sm:$0xff]  ;;  %v396_v20 = vld [vmem:[#allocation12 + $0x140] sm:$0xff]  ;;  %v3936_v21 = vpack.c.bf16 %v389_v16, %v386_v13  ;;  %v3939_v23 = vpack.c.bf16 %v391_v18, %v388_v17  ;;  %v395_v25 = vld [vmem:[#allocation12 + $0x138] sm:$0xff] }
  0x78   :  { %2981 = vmatprep.subr.bf16.mxu0 %v3882_v30  ;;  %3012 = vmatprep.subr.bf16.mxu1 %v3713_v5  ;;  %v392_v22 = vld [vmem:[#allocation12 + $0x120] sm:$0xff]  ;;  %v3942_v24 = vpack.c.bf16 %v396_v20, %v393_v19  ;;  %v394_v26 = vld [vmem:[#allocation12 + $0x130] sm:$0xff]  ;;  %v397_v27 = vld [vmem:[#allocation12 + $0x148] sm:$0xff] }
  0x79   :  { %v399_v28 = vld [vmem:[#allocation12 + $0x158] sm:$0xff]  ;;  %v402_v29 = vld [vmem:[#allocation12 + $0x170] sm:$0xff]  ;;  %v3946_v31 = vpack.c.bf16 %v395_v25, %v392_v22  ;;  %v3949_v33 = vpack.c.bf16 %v397_v27, %v394_v26  ;;  %v401_v35 = vld [vmem:[#allocation12 + $0x168] sm:$0xff] }
  0x7a   :  { %275 = vmatmul.mubr.f32.vlgmr.msra.gmra.mrb[0].mxu0 %v144_v37  ;;  %2607 = vmatmul.mubr.f32.vlgmr.msra.gmra.mrb[0].mxu1 %v144_v37  ;;  %v398_v32 = vld [vmem:[#allocation12 + $0x150] sm:$0xff]  ;;  %v3952_v34 = vpack.c.bf16 %v402_v29, %v399_v28  ;;  %v400_v36 = vld [vmem:[#allocation12 + $0x160] sm:$0xff]  ;;  %v403_v37 = vld [vmem:[#allocation12 + $0x178] sm:$0xff] }
  0x7b   :  { %2983 = vmatpush1.bf16.msra.mxu0 %v3884_v38  ;;  %3014 = vmatpush3.bf16.msra.mxu1 %v3886_v40  ;;  %v3956_v39 = vpack.c.bf16 %v401_v35, %v398_v32  ;;  %v3959_v42 = vpack.c.bf16 %v403_v37, %v400_v36  ;;  %v3967_v43 = vld [vmem:[%s4407_s2] sm:$0x1] }
  0x7c   :  { %2985 = vmatprep.subr.bf16.mxu0 %v3889_v41  ;;  %485 = vmatprep.mubr.f32.mxu0 %v3714_v8  ;;  %v193_v51 = vld [vmem:[%s4409_s4] sm:$0x7] }
  0x7d   :  { %3015 = vmatprep.subr.bf16.mxu1 %v3713_v5  ;;  %2641 = vmatprep.mubr.msk.f32.mxu1 %vm3715_vm0, %v3714_v8  ;;  %v198_v53 = vrot.slane %v193_v51, %v4009_v46  ;;  %v206_v54 = vrot.slane %v193_v51, %v4011_v48  ;;  %v202_v55 = vrot.slane %v193_v51, %v4016_v52  ;;  %v404_v6 = vld [vmem:[%s4411_s6] sm:$0x7] }
  0x7e   :  { %v409_v7 = vrot.slane %v404_v6, %v4009_v46  ;;  %v413_v9 = vrot.slane %v404_v6, %v4016_v52  ;;  %v417_v32 = vrot.slane %v404_v6, %v4011_v48 }
  0x7f   :  { %2987 = vmatpush1.bf16.msra.mxu0 %v3893_v47  ;;  %3017 = vmatpush3.bf16.msra.mxu1 %v3896_v49 }
  0x80   :  { %2989 = vmatprep.subr.bf16.mxu0 %v3899_v50  ;;  %3018 = vmatprep.subr.bf16.mxu1 %v3713_v5 }
  0x83   :  { %2991 = vmatpush1.bf16.msra.mxu0 %v3906_v56  ;;  %3020 = vmatpush3.bf16.msra.mxu1 %v3909_v58 }
  0x84   :  { %2993 = vmatprep.subr.bf16.mxu0 %v3912_v59  ;;  %3021 = vmatprep.subr.bf16.mxu1 %v3713_v5 }
  0x87   :  { %2995 = vmatpush1.bf16.msra.mxu0 %v3916_v1  ;;  %3023 = vmatpush3.bf16.msra.mxu1 %v3919_v3 }
  0x88   :  { %2997 = vmatprep.subr.bf16.mxu0 %v3922_v4  ;;  %3024 = vmatprep.subr.bf16.mxu1 %v3713_v5 }
  0x8b   :  { %2999 = vmatpush1.bf16.msra.mxu0 %v3926_v12  ;;  %3026 = vmatpush3.bf16.msra.mxu1 %v3929_v14 }
  0x8c   :  { %3001 = vmatprep.subr.bf16.mxu0 %v3932_v15  ;;  %3027 = vmatprep.subr.bf16.mxu1 %v3713_v5 }
  0x8f   :  { %3003 = vmatpush1.bf16.msra.mxu0 %v3936_v21  ;;  %3029 = vmatpush3.bf16.msra.mxu1 %v3939_v23 }
  0x90   :  { %3005 = vmatprep.subr.bf16.mxu0 %v3942_v24  ;;  %3030 = vmatprep.subr.bf16.mxu1 %v3713_v5 }
  0x93   :  { %3007 = vmatpush1.bf16.msra.mxu0 %v3946_v31  ;;  %3032 = vmatpush3.bf16.msra.mxu1 %v3949_v33 }
  0x94   :  { %3009 = vmatprep.subr.bf16.mxu0 %v3952_v34  ;;  %3033 = vmatprep.subr.bf16.mxu1 %v3713_v5 }
  0x97   :  { %3011 = vmatpush1.bf16.msra.mxu0 %v3956_v39  ;;  %3035 = vmatpush3.bf16.msra.mxu1 %v3959_v42 }
  0x98   :  { %3037 = vmatprep.subr.bf16.mxu0 %v3882_v30  ;;  %3068 = vmatprep.subr.bf16.mxu1 %v3713_v5 }
  0x9a   :  { %486 = vmatmul.mubr.f32.vlgmr.msra.gmra.mrb[2].mxu0 %v3967_v43  ;;  %2642 = vmatmul.mubr.f32.vlgmr.msra.gmra.mrb[2].mxu1 %v3967_v43 }
  0x9b   :  { %3039 = vmatpush1.bf16.msra.mxu0 %v3884_v38  ;;  %3070 = vmatpush3.bf16.msra.mxu1 %v3886_v40 }
  0x9c   :  { %3041 = vmatprep.subr.bf16.mxu0 %v3889_v41  ;;  %3071 = vmatprep.subr.bf16.mxu1 %v3713_v5 }
  0x9d   :  { %720 = vmatprep.mubr.f32.mxu0 %v3714_v8  ;;  %2676 = vmatprep.mubr.msk.f32.mxu1 %vm3715_vm0, %v3714_v8 }
  0x9f   :  { %3043 = vmatpush1.bf16.msra.mxu0 %v3893_v47  ;;  %3073 = vmatpush3.bf16.msra.mxu1 %v3896_v49 }
  0xa0   :  { %3045 = vmatprep.subr.bf16.mxu0 %v3899_v50  ;;  %3074 = vmatprep.subr.bf16.mxu1 %v3713_v5 }
  0xa3   :  { %3047 = vmatpush1.bf16.msra.mxu0 %v3906_v56  ;;  %3076 = vmatpush3.bf16.msra.mxu1 %v3909_v58 }
  0xa4   :  { %3049 = vmatprep.subr.bf16.mxu0 %v3912_v59  ;;  %3077 = vmatprep.subr.bf16.mxu1 %v3713_v5 }
  0xa7   :  { %3051 = vmatpush1.bf16.msra.mxu0 %v3916_v1  ;;  %3079 = vmatpush3.bf16.msra.mxu1 %v3919_v3 }
  0xa8   :  { %3053 = vmatprep.subr.bf16.mxu0 %v3922_v4  ;;  %3080 = vmatprep.subr.bf16.mxu1 %v3713_v5 }
  0xab   :  { %3055 = vmatpush1.bf16.msra.mxu0 %v3926_v12  ;;  %3082 = vmatpush3.bf16.msra.mxu1 %v3929_v14 }
  0xac   :  { %3057 = vmatprep.subr.bf16.mxu0 %v3932_v15  ;;  %3083 = vmatprep.subr.bf16.mxu1 %v3713_v5 }
  0xaf   :  { %3059 = vmatpush1.bf16.msra.mxu0 %v3936_v21  ;;  %3085 = vmatpush3.bf16.msra.mxu1 %v3939_v23 }
  0xb0   :  { %3061 = vmatprep.subr.bf16.mxu0 %v3942_v24  ;;  %3086 = vmatprep.subr.bf16.mxu1 %v3713_v5 }
  0xb3   :  { %3063 = vmatpush1.bf16.msra.mxu0 %v3946_v31  ;;  %3088 = vmatpush3.bf16.msra.mxu1 %v3949_v33 }
  0xb4   :  { %3065 = vmatprep.subr.bf16.mxu0 %v3952_v34  ;;  %3089 = vmatprep.subr.bf16.mxu1 %v3713_v5 }
  0xb7   :  { %3067 = vmatpush1.bf16.msra.mxu0 %v3956_v39  ;;  %3091 = vmatpush3.bf16.msra.mxu1 %v3959_v42 }
  0xb8   :  { %3093 = vmatprep.subr.bf16.mxu0 %v3882_v30  ;;  %3124 = vmatprep.subr.bf16.mxu1 %v3713_v5 }
 0x14d   :  { %v276_v57 = vpop.f32.mrb[0].mxu0  ;;  %v347_v60 = vpop.f32.mrb[0].mxu1 }
 0x14e   :  { %v277_v61 = vadd.f32 %v276_v57, %v198_v53  ;;  %v278_v62 = vpop.f32.mrb[1].mxu0  ;;  %v348_v63 = vadd.f32 %v347_v60, %v206_v54  ;;  %v2608_v0 = vpop.f32.mrb[1].mxu1 }
 0x14f   :  { %v279_v2 = vadd.f32 %v278_v62, %v202_v55 }
 0x150   :  { %351 = vst [vmem:[#allocation3] sm:$0xff] %v277_v61  ;;  %353 = vst [vmem:[#allocation3 + $0x10] sm:$0xff] %v348_v63 }
 0x151   :  { %352 = vst [vmem:[#allocation3 + $0x8] sm:$0xff] %v279_v2 }
 0x158   :  { %v355_v13 = vld [vmem:[#allocation3] ss:$8 sm:$0x7] }
 0x159   :  { %v570_v22 = vrot.slane %v355_v13, 1  ;;  %v580_v51 = vrot.slane %v355_v13, 2 }
 0x16d   :  { %v487_v10 = vpop.f32.mrb[2].mxu0  ;;  %v558_v11 = vpop.f32.mrb[2].mxu1 }
 0x16e   :  { %v488_v16 = vadd.f32 %v487_v10, %v409_v7  ;;  %v489_v17 = vpop.f32.mrb[3].mxu0  ;;  %v2643_v18 = vpop.f32.mrb[3].mxu1  ;;  %v559_v37 = vadd.f32 %v558_v11, %v417_v32  ;;  %v590_v7 = vld [vmem:[#allocation3 + $0x1] ss:$8 sm:$0x7] }
 0x16f   :  { %v490_v19 = vadd.f32 %v489_v17, %v413_v9  ;;  %v805_v17 = vrot.slane %v590_v7, 1 }
 0x170   :  { %v562_v20 = vadd.f32 %v488_v16, %v355_v13 }
 0x171   :  { %v572_v26 = vadd.f32 %v570_v22, %v490_v19 }
 0x172   :  { %v2387_v25 = vmul.f32 -1.442695, %v562_v20 }
 0x173   :  { %v2388_v27 = vmul.f32 -1.442695, %v572_v26 }
 0x174   :  { %3466 = vpow2.f32 %v2387_v25 }
 0x175   :  { %3468 = vpow2.f32 %v2388_v27 }
 0x17e   :  { %v3467_v28 = vpop.eup %3466 }
 0x17f   :  { %v566_v29 = vadd.f32 1.0, %v3467_v28  ;;  %v3469_v35 = vpop.eup %3468 }
 0x180   :  { %v576_v36 = vadd.f32 1.0, %v3469_v35  ;;  %v815_v35 = vrot.slane %v590_v7, 2 }
 0x181   :  { %3470 = vrcp.f32 %v566_v29 }
 0x182   :  { %3472 = vrcp.f32 %v576_v36 }
 0x18b   :  { %v3471_v44 = vpop.eup %3470 }
 0x18c   :  { %v579_v45 = vmul.f32 %v3471_v44, %v559_v37  ;;  %v3473_v54 = vpop.eup %3472 }
 0x18d   :  { %v584_v55 = vsub.f32 1.0, %v3473_v54  ;;  %v586_v61 = vmul.f32 %v3473_v54, %v3967_v43  ;;  %v639_v43 = vld [vmem:[%s4411_s6] sm:$0x7] }
 0x18e   :  { %v582_v53 = vadd.f32 %v580_v51, %v579_v45  ;;  %v644_v63 = vrot.slane %v639_v43, %v4009_v46  ;;  %v648_v0 = vrot.slane %v639_v43, %v4016_v52  ;;  %v652_v26 = vrot.slane %v639_v43, %v4011_v48 }
 0x190   :  { %3474 = vtanh.f32 %v582_v53 }
 0x19a   :  { %v3475_v57 = vpop.eup %3474 }
 0x19b   :  { %v585_v60 = vmul.f32 %v3475_v57, %v584_v55 }
 0x19d   :  { %v4028_v62 = vadd.f32 %v586_v61, %v585_v60 }
 0x19f   :  { %588 = vst [vmem:[#allocation4] sm:$0x1] %v4028_v62  ;;  %721 = vmatmul.mubr.f32.vlgmr.msra.gmra.mrb[4].mxu0 %v4028_v62  ;;  %2677 = vmatmul.mubr.f32.vlgmr.msra.gmra.mrb[4].mxu1 %v4028_v62 }
 0x1a0   :  { %3095 = vmatpush1.bf16.msra.mxu0 %v3884_v38  ;;  %3126 = vmatpush3.bf16.msra.mxu1 %v3886_v40 }
 0x1a1   :  { %3097 = vmatprep.subr.bf16.mxu0 %v3889_v41  ;;  %3127 = vmatprep.subr.bf16.mxu1 %v3713_v5 }
 0x1a2   :  { %955 = vmatprep.mubr.f32.mxu0 %v3714_v8  ;;  %2711 = vmatprep.mubr.msk.f32.mxu1 %vm3715_vm0, %v3714_v8 }
 0x1a4   :  { %3099 = vmatpush1.bf16.msra.mxu0 %v3893_v47  ;;  %3129 = vmatpush3.bf16.msra.mxu1 %v3896_v49 }
 0x1a5   :  { %3101 = vmatprep.subr.bf16.mxu0 %v3899_v50  ;;  %3130 = vmatprep.subr.bf16.mxu1 %v3713_v5 }
 0x1a8   :  { %3103 = vmatpush1.bf16.msra.mxu0 %v3906_v56  ;;  %3132 = vmatpush3.bf16.msra.mxu1 %v3909_v58 }
 0x1a9   :  { %3105 = vmatprep.subr.bf16.mxu0 %v3912_v59  ;;  %3133 = vmatprep.subr.bf16.mxu1 %v3713_v5 }
 0x1ac   :  { %3107 = vmatpush1.bf16.msra.mxu0 %v3916_v1  ;;  %3135 = vmatpush3.bf16.msra.mxu1 %v3919_v3 }
 0x1ad   :  { %3109 = vmatprep.subr.bf16.mxu0 %v3922_v4  ;;  %3136 = vmatprep.subr.bf16.mxu1 %v3713_v5 }
 0x1b0   :  { %3111 = vmatpush1.bf16.msra.mxu0 %v3926_v12  ;;  %3138 = vmatpush3.bf16.msra.mxu1 %v3929_v14 }
 0x1b1   :  { %3113 = vmatprep.subr.bf16.mxu0 %v3932_v15  ;;  %3139 = vmatprep.subr.bf16.mxu1 %v3713_v5 }
 0x1b4   :  { %3115 = vmatpush1.bf16.msra.mxu0 %v3936_v21  ;;  %3141 = vmatpush3.bf16.msra.mxu1 %v3939_v23 }
 0x1b5   :  { %3117 = vmatprep.subr.bf16.mxu0 %v3942_v24  ;;  %3142 = vmatprep.subr.bf16.mxu1 %v3713_v5 }
 0x1b8   :  { %3119 = vmatpush1.bf16.msra.mxu0 %v3946_v31  ;;  %3144 = vmatpush3.bf16.msra.mxu1 %v3949_v33 }
 0x1b9   :  { %3121 = vmatprep.subr.bf16.mxu0 %v3952_v34  ;;  %3145 = vmatprep.subr.bf16.mxu1 %v3713_v5 }
 0x1bc   :  { %3123 = vmatpush1.bf16.msra.mxu0 %v3956_v39  ;;  %3147 = vmatpush3.bf16.msra.mxu1 %v3959_v42 }
 0x1bd   :  { %3149 = vmatprep.subr.bf16.mxu0 %v3882_v30  ;;  %3180 = vmatprep.subr.bf16.mxu1 %v3713_v5 }
 0x272   :  { %v722_v2 = vpop.f32.mrb[4].mxu0  ;;  %v793_v6 = vpop.f32.mrb[4].mxu1 }
 0x273   :  { %v723_v9 = vadd.f32 %v722_v2, %v644_v63  ;;  %v724_v10 = vpop.f32.mrb[5].mxu0  ;;  %v2678_v11 = vpop.f32.mrb[5].mxu1  ;;  %v794_v28 = vadd.f32 %v793_v6, %v652_v26  ;;  %v1297_v2 = vld [vmem:[#allocation12 + $0x8] sm:$0xff]  ;;  %v1300_v6 = vld [vmem:[#allocation12 + $0x20] sm:$0xff] }
 0x274   :  { %v725_v13 = vadd.f32 %v724_v10, %v648_v0  ;;  %v1299_v10 = vld [vmem:[#allocation12 + $0x18] sm:$0xff]  ;;  %v1298_v11 = vld [vmem:[#allocation12 + $0x10] sm:$0xff] }
 0x275   :  { %v797_v16 = vadd.f32 %v723_v9, %v590_v7  ;;  %v4129_v7 = vpack.c.bf16 %v1300_v6, %v1297_v2  ;;  %v1296_v9 = vld [vmem:[#allocation12] sm:$0xff]  ;;  %v1335_v2 = vld [vmem:[#allocation12 + $0x138] sm:$0xff]  ;;  %v1334_v6 = vld [vmem:[#allocation12 + $0x130] sm:$0xff] }
 0x276   :  { %v807_v18 = vadd.f32 %v805_v17, %v725_v13  ;;  %v4131_v13 = vpack.c.bf16 %v1299_v10, %v1296_v9  ;;  %v1337_v9 = vld [vmem:[#allocation12 + $0x148] sm:$0xff]  ;;  %v1339_v10 = vld [vmem:[#allocation12 + $0x158] sm:$0xff] }
 0x277   :  { %v2389_v30 = vmul.f32 -1.442695, %v797_v16  ;;  %v1301_v16 = vld [vmem:[#allocation12 + $0x28] sm:$0xff] }
 0x278   :  { %v2390_v19 = vmul.f32 -1.442695, %v807_v18  ;;  %v4134_v17 = vpack.c.bf16 %v1301_v16, %v1298_v11  ;;  %v1306_v18 = vld [vmem:[#allocation12 + $0x50] sm:$0xff] }
 0x279   :  { %3476 = vpow2.f32 %v2389_v30  ;;  %v1303_v30 = vld [vmem:[#allocation12 + $0x38] sm:$0xff]  ;;  %v1342_v11 = vld [vmem:[#allocation12 + $0x170] sm:$0xff] }
 0x27a   :  { %3478 = vpow2.f32 %v2390_v19  ;;  %v4138_v19 = vpack.c.bf16 %v1306_v18, %v1303_v30  ;;  %v4193_v30 = vpack.c.bf16 %v1337_v9, %v1334_v6  ;;  %v4195_v18 = vpack.c.bf16 %v1342_v11, %v1339_v10 }
 0x283   :  { %v3477_v20 = vpop.eup %3476 }
 0x284   :  { %v801_v22 = vadd.f32 1.0, %v3477_v20  ;;  %v3479_v25 = vpop.eup %3478  ;;  %v1302_v20 = vld [vmem:[#allocation12 + $0x30] sm:$0xff] }
 0x285   :  { %v811_v27 = vadd.f32 1.0, %v3479_v25  ;;  %v1304_v25 = vld [vmem:[#allocation12 + $0x40] sm:$0xff] }
 0x286   :  { %3480 = vrcp.f32 %v801_v22  ;;  %v1305_v22 = vld [vmem:[#allocation12 + $0x48] sm:$0xff] }
 0x287   :  { %3482 = vrcp.f32 %v811_v27  ;;  %v4141_v26 = vpack.c.bf16 %v1305_v22, %v1302_v20  ;;  %v1307_v27 = vld [vmem:[#allocation12 + $0x58] sm:$0xff]  ;;  %v1338_v20 = vld [vmem:[#allocation12 + $0x150] sm:$0xff]  ;;  %v1341_v22 = vld [vmem:[#allocation12 + $0x168] sm:$0xff] }
 0x290   :  { %v3481_v29 = vpop.eup %3480 }
 0x291   :  { %v814_v32 = vmul.f32 %v3481_v29, %v794_v28  ;;  %v3483_v37 = vpop.eup %3482  ;;  %v4144_v28 = vpack.c.bf16 %v1307_v27, %v1304_v25  ;;  %v1309_v29 = vld [vmem:[#allocation12 + $0x68] sm:$0xff]  ;;  %v1340_v25 = vld [vmem:[#allocation12 + $0x160] sm:$0xff]  ;;  %v1343_v27 = vld [vmem:[#allocation12 + $0x178] sm:$0xff] }
 0x292   :  { %v819_v44 = vsub.f32 1.0, %v3483_v37  ;;  %v821_v53 = vmul.f32 %v3483_v37, %v4028_v62  ;;  %v1311_v37 = vld [vmem:[#allocation12 + $0x78] sm:$0xff] }
 0x293   :  { %v817_v36 = vadd.f32 %v815_v35, %v814_v32  ;;  %v1312_v32 = vld [vmem:[#allocation12 + $0x80] sm:$0xff] }
 0x294   :  { %v4148_v35 = vpack.c.bf16 %v1312_v32, %v1309_v29  ;;  %v4199_v29 = vpack.c.bf16 %v1341_v22, %v1338_v20  ;;  %v4203_v32 = vpack.c.bf16 %v1343_v27, %v1340_v25 }
 0x295   :  { %3484 = vtanh.f32 %v817_v36  ;;  %v1308_v36 = vld [vmem:[#allocation12 + $0x60] sm:$0xff] }
 0x29f   :  { %v3485_v45 = vpop.eup %3484 }
 0x2a0   :  { %v820_v51 = vmul.f32 %v3485_v45, %v819_v44  ;;  %v1310_v44 = vld [vmem:[#allocation12 + $0x70] sm:$0xff]  ;;  %v4151_v45 = vpack.c.bf16 %v1311_v37, %v1308_v36  ;;  %v1109_v36 = vld [vmem:[%s4411_s6] sm:$0x7] }
 0x2a1   :  { %v1114_v37 = vrot.slane %v1109_v36, %v4009_v46 }
 0x2a2   :  { %v4075_v54 = vadd.f32 %v821_v53, %v820_v51  ;;  %v1313_v51 = vld [vmem:[#allocation12 + $0x88] sm:$0xff] }
 0x2a3   :  { %v4154_v53 = vpack.c.bf16 %v1313_v51, %v1310_v44  ;;  %v1118_v44 = vrot.slane %v1109_v36, %v4016_v52 }
 0x2a4   :  { %823 = vst [vmem:[#allocation4 + $0x1] sm:$0x1] %v4075_v54  ;;  %956 = vmatmul.mubr.f32.vlgmr.msra.gmra.mrb[6].mxu0 %v4075_v54  ;;  %2712 = vmatmul.mubr.f32.vlgmr.msra.gmra.mrb[6].mxu1 %v4075_v54 }
 0x2a5   :  { %3151 = vmatpush1.bf16.msra.mxu0 %v3884_v38  ;;  %3182 = vmatpush3.bf16.msra.mxu1 %v3886_v40  ;;  %v874_v38 = vld [vmem:[%s4411_s6] sm:$0x7] }
 0x2a6   :  { %3153 = vmatprep.subr.bf16.mxu0 %v3889_v41  ;;  %3183 = vmatprep.subr.bf16.mxu1 %v3713_v5  ;;  %v879_v40 = vrot.slane %v874_v38, %v4009_v46  ;;  %v883_v41 = vrot.slane %v874_v38, %v4016_v52 }
 0x2a7   :  { %1190 = vmatprep.mubr.f32.mxu0 %v3714_v8  ;;  %2746 = vmatprep.mubr.msk.f32.mxu1 %vm3715_vm0, %v3714_v8 }
 0x2a9   :  { %3155 = vmatpush1.bf16.msra.mxu0 %v3893_v47  ;;  %3185 = vmatpush3.bf16.msra.mxu1 %v3896_v49 }
 0x2aa   :  { %3157 = vmatprep.subr.bf16.mxu0 %v3899_v50  ;;  %3186 = vmatprep.subr.bf16.mxu1 %v3713_v5  ;;  %v825_v50 = vld [vmem:[#allocation3 + $0x2] ss:$8 sm:$0x7] }
 0x2ab   :  { %v1050_v55 = vrot.slane %v825_v50, 2 }
 0x2ad   :  { %3159 = vmatpush1.bf16.msra.mxu0 %v3906_v56  ;;  %3188 = vmatpush3.bf16.msra.mxu1 %v3909_v58 }
 0x2ae   :  { %3161 = vmatprep.subr.bf16.mxu0 %v3912_v59  ;;  %3189 = vmatprep.subr.bf16.mxu1 %v3713_v5 }
 0x2b1   :  { %3163 = vmatpush1.bf16.msra.mxu0 %v3916_v1  ;;  %3191 = vmatpush3.bf16.msra.mxu1 %v3919_v3 }
 0x2b2   :  { %3165 = vmatprep.subr.bf16.mxu0 %v3922_v4  ;;  %3192 = vmatprep.subr.bf16.mxu1 %v3713_v5  ;;  %v1040_v4 = vrot.slane %v825_v50, 1 }
 0x2b5   :  { %3167 = vmatpush1.bf16.msra.mxu0 %v3926_v12  ;;  %3194 = vmatpush3.bf16.msra.mxu1 %v3929_v14 }
 0x2b6   :  { %3169 = vmatprep.subr.bf16.mxu0 %v3932_v15  ;;  %3195 = vmatprep.subr.bf16.mxu1 %v3713_v5 }
 0x2b9   :  { %3171 = vmatpush1.bf16.msra.mxu0 %v3936_v21  ;;  %3197 = vmatpush3.bf16.msra.mxu1 %v3939_v23 }
 0x2ba   :  { %3173 = vmatprep.subr.bf16.mxu0 %v3942_v24  ;;  %3198 = vmatprep.subr.bf16.mxu1 %v3713_v5 }
 0x2bd   :  { %3175 = vmatpush1.bf16.msra.mxu0 %v3946_v31  ;;  %3200 = vmatpush3.bf16.msra.mxu1 %v3949_v33  ;;  %v887_v31 = vrot.slane %v874_v38, %v4011_v48  ;;  %v1318_v38 = vld [vmem:[#allocation12 + $0xb0] sm:$0xff] }
 0x2be   :  { %3177 = vmatprep.subr.bf16.mxu0 %v3952_v34  ;;  %3201 = vmatprep.subr.bf16.mxu1 %v3713_v5 }
 0x2c1   :  { %3179 = vmatpush1.bf16.msra.mxu0 %v3956_v39  ;;  %3203 = vmatpush3.bf16.msra.mxu1 %v3959_v42 }
 0x2c2   :  { %3236 = vmatprep.subr.bf16.mxu1 %v3713_v5  ;;  %3205 = vmatprep.subr.bf16.mxu0 %v4129_v7 }
 0x377   :  { %v957_v47 = vpop.f32.mrb[6].mxu0  ;;  %v1028_v49 = vpop.f32.mrb[6].mxu1 }
 0x378   :  { %v958_v56 = vadd.f32 %v957_v47, %v879_v40  ;;  %v959_v58 = vpop.f32.mrb[7].mxu0  ;;  %v2713_v59 = vpop.f32.mrb[7].mxu1  ;;  %v1029_v34 = vadd.f32 %v1028_v49, %v887_v31  ;;  %v1317_v47 = vld [vmem:[#allocation12 + $0xa8] sm:$0xff]  ;;  %v1316_v49 = vld [vmem:[#allocation12 + $0xa0] sm:$0xff] }
 0x379   :  { %v960_v1 = vadd.f32 %v959_v58, %v883_v41  ;;  %v1314_v41 = vld [vmem:[#allocation12 + $0x90] sm:$0xff]  ;;  %v1321_v59 = vld [vmem:[#allocation12 + $0xc8] sm:$0xff] }
 0x37a   :  { %v1032_v3 = vadd.f32 %v958_v56, %v825_v50  ;;  %v4161_v50 = vpack.c.bf16 %v1317_v47, %v1314_v41  ;;  %v1319_v56 = vld [vmem:[#allocation12 + $0xb8] sm:$0xff] }
 0x37b   :  { %v1042_v14 = vadd.f32 %v1040_v4, %v960_v1  ;;  %v4164_v58 = vpack.c.bf16 %v1319_v56, %v1316_v49  ;;  %v1324_v1 = vld [vmem:[#allocation12 + $0xe0] sm:$0xff] }
 0x37c   :  { %v2391_v12 = vmul.f32 -1.442695, %v1032_v3  ;;  %v4168_v3 = vpack.c.bf16 %v1324_v1, %v1321_v59  ;;  %v1320_v4 = vld [vmem:[#allocation12 + $0xc0] sm:$0xff] }
 0x37d   :  { %v2392_v15 = vmul.f32 -1.442695, %v1042_v14  ;;  %v1322_v14 = vld [vmem:[#allocation12 + $0xd0] sm:$0xff] }
 0x37e   :  { %3486 = vpow2.f32 %v2391_v12  ;;  %v1323_v12 = vld [vmem:[#allocation12 + $0xd8] sm:$0xff] }
 0x37f   :  { %3488 = vpow2.f32 %v2392_v15  ;;  %v4171_v15 = vpack.c.bf16 %v1323_v12, %v1320_v4 }
 0x388   :  { %v3487_v21 = vpop.eup %3486 }
 0x389   :  { %v1036_v23 = vadd.f32 1.0, %v3487_v21  ;;  %v3489_v24 = vpop.eup %3488  ;;  %v1325_v21 = vld [vmem:[#allocation12 + $0xe8] sm:$0xff] }
 0x38a   :  { %v1046_v33 = vadd.f32 1.0, %v3489_v24  ;;  %v1330_v24 = vld [vmem:[#allocation12 + $0x110] sm:$0xff]  ;;  %v4174_v31 = vpack.c.bf16 %v1325_v21, %v1322_v14 }
 0x38b   :  { %3490 = vrcp.f32 %v1036_v23  ;;  %v1327_v23 = vld [vmem:[#allocation12 + $0xf8] sm:$0xff] }
 0x38c   :  { %3492 = vrcp.f32 %v1046_v33  ;;  %v4176_v33 = vpack.c.bf16 %v1330_v24, %v1327_v23 }
 0x395   :  { %v3491_v39 = vpop.eup %3490 }
 0x396   :  { %v1049_v42 = vmul.f32 %v3491_v39, %v1029_v34  ;;  %v3493_v60 = vpop.eup %3492  ;;  %v1326_v34 = vld [vmem:[#allocation12 + $0xf0] sm:$0xff]  ;;  %v1329_v39 = vld [vmem:[#allocation12 + $0x108] sm:$0xff] }
 0x397   :  { %v1054_v61 = vsub.f32 1.0, %v3493_v60  ;;  %v1056_v63 = vmul.f32 %v3493_v60, %v4075_v54  ;;  %v1315_v54 = vld [vmem:[#allocation12 + $0x98] sm:$0xff]  ;;  %v1333_v60 = vld [vmem:[#allocation12 + $0x128] sm:$0xff] }
 0x398   :  { %v1052_v57 = vadd.f32 %v1050_v55, %v1049_v42  ;;  %v4158_v40 = vpack.c.bf16 %v1318_v38, %v1315_v54  ;;  %v1328_v42 = vld [vmem:[#allocation12 + $0x100] sm:$0xff]  ;;  %v4179_v55 = vpack.c.bf16 %v1329_v39, %v1326_v34  ;;  %v1122_v34 = vrot.slane %v1109_v36, %v4011_v48 }
 0x399   :  { %v1060_v38 = vld [vmem:[#allocation3 + $0x3] ss:$8 sm:$0x7] }
 0x39a   :  { %3494 = vtanh.f32 %v1052_v57  ;;  %v1331_v57 = vld [vmem:[#allocation12 + $0x118] sm:$0xff]  ;;  %v1275_v1 = vrot.slane %v1060_v38, 1 }
 0x3a4   :  { %v3495_v62 = vpop.eup %3494 }
 0x3a5   :  { %v1055_v43 = vmul.f32 %v3495_v62, %v1054_v61  ;;  %v1336_v61 = vld [vmem:[#allocation12 + $0x140] sm:$0xff]  ;;  %v4183_v62 = vpack.c.bf16 %v1331_v57, %v1328_v42 }
 0x3a7   :  { %v4121_v0 = vadd.f32 %v1056_v63, %v1055_v43  ;;  %v4185_v43 = vpack.c.bf16 %v1336_v61, %v1333_v60  ;;  %v1332_v63 = vld [vmem:[#allocation12 + $0x120] sm:$0xff]  ;;  %v1285_v61 = vrot.slane %v1060_v38, 2 }
 0x3a8   :  { %v4189_v16 = vpack.c.bf16 %v1335_v2, %v1332_v63 }
 0x3a9   :  { %1058 = vst [vmem:[#allocation4 + $0x2] sm:$0x1] %v4121_v0  ;;  %1191 = vmatmul.mubr.f32.vlgmr.msra.gmra.mrb[8].mxu0 %v4121_v0  ;;  %2747 = vmatmul.mubr.f32.vlgmr.msra.gmra.mrb[8].mxu1 %v4121_v0 }
 0x3aa   :  { %1425 = vmatprep.mubr.f32.mxu0 %v3714_v8  ;;  %2781 = vmatprep.mubr.msk.f32.mxu1 %vm3715_vm0, %v3714_v8 }
 0x3ab   :  { %3207 = vmatpush1.bf16.msra.mxu0 %v4131_v13  ;;  %3238 = vmatpush3.bf16.msra.mxu1 %v4134_v17 }
 0x3ac   :  { %3239 = vmatprep.subr.bf16.mxu1 %v3713_v5  ;;  %3209 = vmatprep.subr.bf16.mxu0 %v4138_v19 }
 0x3af   :  { %3211 = vmatpush1.bf16.msra.mxu0 %v4141_v26  ;;  %3241 = vmatpush3.bf16.msra.mxu1 %v4144_v28 }
 0x3b0   :  { %3242 = vmatprep.subr.bf16.mxu1 %v3713_v5  ;;  %3213 = vmatprep.subr.bf16.mxu0 %v4148_v35 }
 0x3b3   :  { %3215 = vmatpush1.bf16.msra.mxu0 %v4151_v45  ;;  %3244 = vmatpush3.bf16.msra.mxu1 %v4154_v53 }
 0x3b4   :  { %3245 = vmatprep.subr.bf16.mxu1 %v3713_v5  ;;  %3217 = vmatprep.subr.bf16.mxu0 %v4158_v40 }
 0x3b7   :  { %3219 = vmatpush1.bf16.msra.mxu0 %v4161_v50  ;;  %3247 = vmatpush3.bf16.msra.mxu1 %v4164_v58 }
 0x3b8   :  { %3248 = vmatprep.subr.bf16.mxu1 %v3713_v5  ;;  %3221 = vmatprep.subr.bf16.mxu0 %v4168_v3 }
 0x3bb   :  { %3223 = vmatpush1.bf16.msra.mxu0 %v4171_v15  ;;  %3250 = vmatpush3.bf16.msra.mxu1 %v4174_v31 }
 0x3bc   :  { %3225 = vmatprep.subr.bf16.mxu0 %v4176_v33  ;;  %3251 = vmatprep.subr.bf16.mxu1 %v3713_v5 }
 0x3bf   :  { %3227 = vmatpush1.bf16.msra.mxu0 %v4179_v55  ;;  %3253 = vmatpush3.bf16.msra.mxu1 %v4183_v62 }
 0x3c0   :  { %3229 = vmatprep.subr.bf16.mxu0 %v4185_v43  ;;  %3254 = vmatprep.subr.bf16.mxu1 %v3713_v5 }
 0x3c3   :  { %3231 = vmatpush1.bf16.msra.mxu0 %v4189_v16  ;;  %3256 = vmatpush3.bf16.msra.mxu1 %v4193_v30 }
 0x3c4   :  { %3233 = vmatprep.subr.bf16.mxu0 %v4195_v18  ;;  %3257 = vmatprep.subr.bf16.mxu1 %v3713_v5 }
 0x3c7   :  { %3235 = vmatpush1.bf16.msra.mxu0 %v4199_v29  ;;  %3259 = vmatpush3.bf16.msra.mxu1 %v4203_v32 }
 0x3c8   :  { %3261 = vmatprep.subr.bf16.mxu0 %v4129_v7  ;;  %3292 = vmatprep.subr.bf16.mxu1 %v3713_v5 }
 0x47c   :  { %v1192_v51 = vpop.f32.mrb[8].mxu0  ;;  %v1263_v54 = vpop.f32.mrb[8].mxu1 }
 0x47d   :  { %v1193_v41 = vadd.f32 %v1192_v51, %v1114_v37  ;;  %v1194_v47 = vpop.f32.mrb[9].mxu0  ;;  %v2748_v49 = vpop.f32.mrb[9].mxu1  ;;  %v1264_v42 = vadd.f32 %v1263_v54, %v1122_v34  ;;  %v1295_v37 = vld [vmem:[#allocation3 + $0x4] ss:$8 sm:$0x7] }
 0x47e   :  { %v1195_v56 = vadd.f32 %v1194_v47, %v1118_v44  ;;  %v1510_v47 = vrot.slane %v1295_v37, 1 }
 0x47f   :  { %v1267_v59 = vadd.f32 %v1193_v41, %v1060_v38 }
 0x480   :  { %v1277_v12 = vadd.f32 %v1275_v1, %v1195_v56 }
 0x481   :  { %v2393_v4 = vmul.f32 -1.442695, %v1267_v59 }
 0x482   :  { %v2394_v14 = vmul.f32 -1.442695, %v1277_v12 }
 0x483   :  { %3496 = vpow2.f32 %v2393_v4 }
 0x484   :  { %3498 = vpow2.f32 %v2394_v14 }
 0x48d   :  { %v3497_v21 = vpop.eup %3496 }
 0x48e   :  { %v1271_v23 = vadd.f32 1.0, %v3497_v21  ;;  %v3499_v24 = vpop.eup %3498 }
 0x48f   :  { %v1281_v39 = vadd.f32 1.0, %v3499_v24 }
 0x490   :  { %3500 = vrcp.f32 %v1271_v23 }
 0x491   :  { %3502 = vrcp.f32 %v1281_v39  ;;  %v1520_v39 = vrot.slane %v1295_v37, 2 }
 0x49a   :  { %v3501_v57 = vpop.eup %3500 }
 0x49b   :  { %v1284_v60 = vmul.f32 %v3501_v57, %v1264_v42  ;;  %v3503_v2 = vpop.eup %3502 }
 0x49c   :  { %v1289_v6 = vsub.f32 1.0, %v3503_v2  ;;  %v1291_v11 = vmul.f32 %v3503_v2, %v4121_v0  ;;  %v1344_v0 = vld [vmem:[%s4411_s6] sm:$0x7] }
 0x49d   :  { %v1287_v63 = vadd.f32 %v1285_v61, %v1284_v60  ;;  %v1349_v22 = vrot.slane %v1344_v0, %v4009_v46  ;;  %v1353_v25 = vrot.slane %v1344_v0, %v4016_v52  ;;  %v1357_v14 = vrot.slane %v1344_v0, %v4011_v48 }
 0x49f   :  { %3504 = vtanh.f32 %v1287_v63 }
 0x4a9   :  { %v3505_v9 = vpop.eup %3504 }
 0x4aa   :  { %v1290_v10 = vmul.f32 %v3505_v9, %v1289_v6  ;;  %v1579_v9 = vld [vmem:[%s4411_s6] sm:$0x7] }
 0x4ac   :  { %v4217_v20 = vadd.f32 %v1291_v11, %v1290_v10  ;;  %v1584_v10 = vrot.slane %v1579_v9, %v4009_v46  ;;  %v1588_v11 = vrot.slane %v1579_v9, %v4016_v52 }
 0x4ae   :  { %1293 = vst [vmem:[#allocation4 + $0x3] sm:$0x1] %v4217_v20  ;;  %1426 = vmatmul.mubr.f32.vlgmr.msra.gmra.mrb[10].mxu0 %v4217_v20  ;;  %2782 = vmatmul.mubr.f32.vlgmr.msra.gmra.mrb[10].mxu1 %v4217_v20 }
 0x4af   :  { %3263 = vmatpush1.bf16.msra.mxu0 %v4131_v13  ;;  %3294 = vmatpush3.bf16.msra.mxu1 %v4134_v17 }
 0x4b0   :  { %3265 = vmatprep.subr.bf16.mxu0 %v4138_v19  ;;  %3295 = vmatprep.subr.bf16.mxu1 %v3713_v5 }
 0x4b1   :  { %1660 = vmatprep.mubr.f32.mxu0 %v3714_v8  ;;  %2816 = vmatprep.mubr.msk.f32.mxu1 %vm3715_vm0, %v3714_v8 }
 0x4b3   :  { %3267 = vmatpush1.bf16.msra.mxu0 %v4141_v26  ;;  %3297 = vmatpush3.bf16.msra.mxu1 %v4144_v28 }
 0x4b4   :  { %3269 = vmatprep.subr.bf16.mxu0 %v4148_v35  ;;  %3298 = vmatprep.subr.bf16.mxu1 %v3713_v5 }
 0x4b7   :  { %3271 = vmatpush1.bf16.msra.mxu0 %v4151_v45  ;;  %3300 = vmatpush3.bf16.msra.mxu1 %v4154_v53 }
 0x4b8   :  { %3273 = vmatprep.subr.bf16.mxu0 %v4158_v40  ;;  %3301 = vmatprep.subr.bf16.mxu1 %v3713_v5 }
 0x4bb   :  { %3275 = vmatpush1.bf16.msra.mxu0 %v4161_v50  ;;  %3303 = vmatpush3.bf16.msra.mxu1 %v4164_v58 }
 0x4bc   :  { %3277 = vmatprep.subr.bf16.mxu0 %v4168_v3  ;;  %3304 = vmatprep.subr.bf16.mxu1 %v3713_v5 }
 0x4bf   :  { %3279 = vmatpush1.bf16.msra.mxu0 %v4171_v15  ;;  %3306 = vmatpush3.bf16.msra.mxu1 %v4174_v31 }
 0x4c0   :  { %3281 = vmatprep.subr.bf16.mxu0 %v4176_v33  ;;  %3307 = vmatprep.subr.bf16.mxu1 %v3713_v5 }
 0x4c3   :  { %3283 = vmatpush1.bf16.msra.mxu0 %v4179_v55  ;;  %3309 = vmatpush3.bf16.msra.mxu1 %v4183_v62 }
 0x4c4   :  { %3285 = vmatprep.subr.bf16.mxu0 %v4185_v43  ;;  %3310 = vmatprep.subr.bf16.mxu1 %v3713_v5 }
 0x4c7   :  { %3287 = vmatpush1.bf16.msra.mxu0 %v4189_v16  ;;  %3312 = vmatpush3.bf16.msra.mxu1 %v4193_v30 }
 0x4c8   :  { %3289 = vmatprep.subr.bf16.mxu0 %v4195_v18  ;;  %3313 = vmatprep.subr.bf16.mxu1 %v3713_v5 }
 0x4cb   :  { %3291 = vmatpush1.bf16.msra.mxu0 %v4199_v29  ;;  %3315 = vmatpush3.bf16.msra.mxu1 %v4203_v32 }
 0x4cc   :  { %3317 = vmatprep.subr.bf16.mxu0 %v4129_v7  ;;  %3348 = vmatprep.subr.bf16.mxu1 %v3713_v5 }
 0x581   :  { %v1427_v27 = vpop.f32.mrb[10].mxu0  ;;  %v1498_v36 = vpop.f32.mrb[10].mxu1 }
 0x582   :  { %v1428_v44 = vadd.f32 %v1427_v27, %v1349_v22  ;;  %v1429_v51 = vpop.f32.mrb[11].mxu0  ;;  %v2783_v54 = vpop.f32.mrb[11].mxu1  ;;  %v1499_v23 = vadd.f32 %v1498_v36, %v1357_v14  ;;  %v1530_v22 = vld [vmem:[#allocation3 + $0x5] ss:$8 sm:$0x7] }
 0x583   :  { %v1430_v38 = vadd.f32 %v1429_v51, %v1353_v25  ;;  %v1745_v51 = vrot.slane %v1530_v22, 1  ;;  %v1755_v14 = vrot.slane %v1530_v22, 2 }
 0x584   :  { %v1502_v41 = vadd.f32 %v1428_v44, %v1295_v37 }
 0x585   :  { %v1512_v56 = vadd.f32 %v1510_v47, %v1430_v38 }
 0x586   :  { %v2395_v49 = vmul.f32 -1.442695, %v1502_v41 }
 0x587   :  { %v2396_v59 = vmul.f32 -1.442695, %v1512_v56  ;;  %v1592_v56 = vrot.slane %v1579_v9, %v4011_v48 }
 0x588   :  { %3506 = vpow2.f32 %v2395_v49 }
 0x589   :  { %3508 = vpow2.f32 %v2396_v59 }
 0x592   :  { %v3507_v1 = vpop.eup %3506 }
 0x593   :  { %v1506_v4 = vadd.f32 1.0, %v3507_v1  ;;  %v3509_v12 = vpop.eup %3508 }
 0x594   :  { %v1516_v21 = vadd.f32 1.0, %v3509_v12 }
 0x595   :  { %3510 = vrcp.f32 %v1506_v4 }
 0x596   :  { %3512 = vrcp.f32 %v1516_v21 }
 0x59f   :  { %v3511_v24 = vpop.eup %3510 }
 0x5a0   :  { %v1519_v34 = vmul.f32 %v3511_v24, %v1499_v23  ;;  %v3513_v57 = vpop.eup %3512 }
 0x5a1   :  { %v1524_v60 = vsub.f32 1.0, %v3513_v57  ;;  %v1526_v2 = vmul.f32 %v3513_v57, %v4217_v20 }
 0x5a2   :  { %v1522_v42 = vadd.f32 %v1520_v39, %v1519_v34 }
 0x5a4   :  { %3514 = vtanh.f32 %v1522_v42 }
 0x5ae   :  { %v3515_v61 = vpop.eup %3514 }
 0x5af   :  { %v1525_v63 = vmul.f32 %v3515_v61, %v1524_v60 }
 0x5b1   :  { %v4264_v6 = vadd.f32 %v1526_v2, %v1525_v63 }
 0x5b3   :  { %1528 = vst [vmem:[#allocation4 + $0x4] sm:$0x1] %v4264_v6  ;;  %1661 = vmatmul.mubr.f32.vlgmr.msra.gmra.mrb[12].mxu0 %v4264_v6  ;;  %2817 = vmatmul.mubr.f32.vlgmr.msra.gmra.mrb[12].mxu1 %v4264_v6 }
 0x5b4   :  { %3319 = vmatpush1.bf16.msra.mxu0 %v4131_v13  ;;  %3350 = vmatpush3.bf16.msra.mxu1 %v4134_v17 }
 0x5b5   :  { %3321 = vmatprep.subr.bf16.mxu0 %v4138_v19  ;;  %3351 = vmatprep.subr.bf16.mxu1 %v3713_v5 }
 0x5b6   :  { %1895 = vmatprep.mubr.f32.mxu0 %v3714_v8  ;;  %2851 = vmatprep.mubr.msk.f32.mxu1 %vm3715_vm0, %v3714_v8 }
 0x5b8   :  { %3323 = vmatpush1.bf16.msra.mxu0 %v4141_v26  ;;  %3353 = vmatpush3.bf16.msra.mxu1 %v4144_v28 }
 0x5b9   :  { %3325 = vmatprep.subr.bf16.mxu0 %v4148_v35  ;;  %3354 = vmatprep.subr.bf16.mxu1 %v3713_v5 }
 0x5bc   :  { %3327 = vmatpush1.bf16.msra.mxu0 %v4151_v45  ;;  %3356 = vmatpush3.bf16.msra.mxu1 %v4154_v53 }
 0x5bd   :  { %3329 = vmatprep.subr.bf16.mxu0 %v4158_v40  ;;  %3357 = vmatprep.subr.bf16.mxu1 %v3713_v5 }
 0x5c0   :  { %3331 = vmatpush1.bf16.msra.mxu0 %v4161_v50  ;;  %3359 = vmatpush3.bf16.msra.mxu1 %v4164_v58 }
 0x5c1   :  { %3333 = vmatprep.subr.bf16.mxu0 %v4168_v3  ;;  %3360 = vmatprep.subr.bf16.mxu1 %v3713_v5 }
 0x5c4   :  { %3335 = vmatpush1.bf16.msra.mxu0 %v4171_v15  ;;  %3362 = vmatpush3.bf16.msra.mxu1 %v4174_v31 }
 0x5c5   :  { %3337 = vmatprep.subr.bf16.mxu0 %v4176_v33  ;;  %3363 = vmatprep.subr.bf16.mxu1 %v3713_v5 }
 0x5c8   :  { %3339 = vmatpush1.bf16.msra.mxu0 %v4179_v55  ;;  %3365 = vmatpush3.bf16.msra.mxu1 %v4183_v62 }
 0x5c9   :  { %3341 = vmatprep.subr.bf16.mxu0 %v4185_v43  ;;  %3366 = vmatprep.subr.bf16.mxu1 %v3713_v5 }
 0x5cc   :  { %3343 = vmatpush1.bf16.msra.mxu0 %v4189_v16  ;;  %3368 = vmatpush3.bf16.msra.mxu1 %v4193_v30 }
 0x5cd   :  { %3345 = vmatprep.subr.bf16.mxu0 %v4195_v18  ;;  %3369 = vmatprep.subr.bf16.mxu1 %v3713_v5 }
 0x5d0   :  { %3347 = vmatpush1.bf16.msra.mxu0 %v4199_v29  ;;  %3371 = vmatpush3.bf16.msra.mxu1 %v4203_v32 }
 0x5d1   :  { %3373 = vmatprep.subr.bf16.mxu0 %v4129_v7  ;;  %3404 = vmatprep.subr.bf16.mxu1 %v3713_v5 }
 0x686   :  { %v1662_v20 = vpop.f32.mrb[12].mxu0  ;;  %v1733_v0 = vpop.f32.mrb[12].mxu1 }
 0x687   :  { %v1663_v25 = vadd.f32 %v1662_v20, %v1584_v10  ;;  %v1664_v27 = vpop.f32.mrb[13].mxu0  ;;  %v2818_v36 = vpop.f32.mrb[13].mxu1  ;;  %v1734_v1 = vadd.f32 %v1733_v0, %v1592_v56  ;;  %v2236_v20 = vld [vmem:[#allocation13] sm:$0xff]  ;;  %v2237_v0 = vld [vmem:[#allocation13 + $0x8] sm:$0xff]  ;;  %v2247_v56 = vld [vmem:[#allocation13 + $0x58] sm:$0xff] }
 0x688   :  { %v1665_v37 = vadd.f32 %v1664_v27, %v1588_v11  ;;  %v2239_v27 = vld [vmem:[#allocation13 + $0x18] sm:$0xff] }
 0x689   :  { %v1737_v44 = vadd.f32 %v1663_v25, %v1530_v22  ;;  %v3429_v22 = vpack.c.bf16 %v2237_v0, %v2236_v20  ;;  %v2238_v25 = vld [vmem:[#allocation13 + $0x10] sm:$0xff] }
 0x68a   :  { %v1747_v54 = vadd.f32 %v1745_v51, %v1665_v37  ;;  %v3432_v36 = vpack.c.bf16 %v2239_v27, %v2238_v25  ;;  %v2240_v37 = vld [vmem:[#allocation13 + $0x20] sm:$0xff] }
 0x68b   :  { %v2397_v7 = vmul.f32 -1.442695, %v1737_v44  ;;  %v2241_v44 = vld [vmem:[#allocation13 + $0x28] sm:$0xff] }
 0x68c   :  { %v2398_v38 = vmul.f32 -1.442695, %v1747_v54  ;;  %v3435_v51 = vpack.c.bf16 %v2241_v44, %v2240_v37 }
 0x68d   :  { %3516 = vpow2.f32 %v2397_v7  ;;  %v2242_v7 = vld [vmem:[#allocation13 + $0x30] sm:$0xff] }
 0x68e   :  { %3518 = vpow2.f32 %v2398_v38  ;;  %v2244_v38 = vld [vmem:[#allocation13 + $0x40] sm:$0xff] }
 0x697   :  { %v3517_v41 = vpop.eup %3516 }
 0x698   :  { %v1741_v47 = vadd.f32 1.0, %v3517_v41  ;;  %v3519_v49 = vpop.eup %3518  ;;  %v2245_v41 = vld [vmem:[#allocation13 + $0x48] sm:$0xff] }
 0x699   :  { %v1751_v59 = vadd.f32 1.0, %v3519_v49  ;;  %v2246_v49 = vld [vmem:[#allocation13 + $0x50] sm:$0xff] }
 0x69a   :  { %3520 = vrcp.f32 %v1741_v47  ;;  %v3441_v47 = vpack.c.bf16 %v2245_v41, %v2244_v38 }
 0x69b   :  { %3522 = vrcp.f32 %v1751_v59  ;;  %v2248_v59 = vld [vmem:[#allocation13 + $0x60] sm:$0xff] }
 0x6a4   :  { %v3521_v4 = vpop.eup %3520 }
 0x6a5   :  { %v1754_v12 = vmul.f32 %v3521_v4, %v1734_v1  ;;  %v3523_v23 = vpop.eup %3522  ;;  %v3444_v1 = vpack.c.bf16 %v2247_v56, %v2246_v49  ;;  %v2249_v4 = vld [vmem:[#allocation13 + $0x68] sm:$0xff] }
 0x6a6   :  { %v1759_v24 = vsub.f32 1.0, %v3523_v23  ;;  %v1761_v42 = vmul.f32 %v3523_v23, %v4264_v6 }
 0x6a7   :  { %v1757_v21 = vadd.f32 %v1755_v14, %v1754_v12  ;;  %v3447_v12 = vpack.c.bf16 %v2249_v4, %v2248_v59  ;;  %v2250_v14 = vld [vmem:[#allocation13 + $0x70] sm:$0xff] }
 0x6a9   :  { %3524 = vtanh.f32 %v1757_v21  ;;  %v2251_v21 = vld [vmem:[#allocation13 + $0x78] sm:$0xff] }
 0x6aa   :  { %v3450_v23 = vpack.c.bf16 %v2251_v21, %v2250_v14 }
 0x6b3   :  { %v3525_v34 = vpop.eup %3524 }
 0x6b4   :  { %v1760_v39 = vmul.f32 %v3525_v34, %v1759_v24  ;;  %v2049_v24 = vld [vmem:[%s4411_s6] sm:$0x7] }
 0x6b5   :  { %v2054_v34 = vrot.slane %v2049_v24, %v4009_v46 }
 0x6b6   :  { %v4311_v57 = vadd.f32 %v1761_v42, %v1760_v39  ;;  %v2058_v39 = vrot.slane %v2049_v24, %v4016_v52 }
 0x6b8   :  { %1763 = vst [vmem:[#allocation4 + $0x5] sm:$0x1] %v4311_v57  ;;  %1896 = vmatmul.mubr.f32.vlgmr.msra.gmra.mrb[14].mxu0 %v4311_v57  ;;  %2852 = vmatmul.mubr.f32.vlgmr.msra.gmra.mrb[14].mxu1 %v4311_v57 }
 0x6b9   :  { %3375 = vmatpush1.bf16.msra.mxu0 %v4131_v13  ;;  %3406 = vmatpush3.bf16.msra.mxu1 %v4134_v17  ;;  %v1814_v13 = vld [vmem:[%s4411_s6] sm:$0x7] }
 0x6ba   :  { %3377 = vmatprep.subr.bf16.mxu0 %v4138_v19  ;;  %3407 = vmatprep.subr.bf16.mxu1 %v3713_v5  ;;  %v1819_v17 = vrot.slane %v1814_v13, %v4009_v46  ;;  %v1823_v19 = vrot.slane %v1814_v13, %v4016_v52  ;;  %v2062_v52 = vrot.slane %v2049_v24, %v4011_v48 }
 0x6bb   :  { %2130 = vmatprep.mubr.f32.mxu0 %v3714_v8  ;;  %2886 = vmatprep.mubr.msk.f32.mxu1 %vm3715_vm0, %v3714_v8 }
 0x6bd   :  { %3379 = vmatpush1.bf16.msra.mxu0 %v4141_v26  ;;  %3409 = vmatpush3.bf16.msra.mxu1 %v4144_v28 }
 0x6be   :  { %3381 = vmatprep.subr.bf16.mxu0 %v4148_v35  ;;  %3410 = vmatprep.subr.bf16.mxu1 %v3713_v5  ;;  %v1765_v35 = vld [vmem:[#allocation3 + $0x6] ss:$8 sm:$0x7] }
 0x6bf   :  { %v1990_v60 = vrot.slane %v1765_v35, 2 }
 0x6c1   :  { %3383 = vmatpush1.bf16.msra.mxu0 %v4151_v45  ;;  %3412 = vmatpush3.bf16.msra.mxu1 %v4154_v53 }
 0x6c2   :  { %3385 = vmatprep.subr.bf16.mxu0 %v4158_v40  ;;  %3413 = vmatprep.subr.bf16.mxu1 %v3713_v5 }
 0x6c5   :  { %3387 = vmatpush1.bf16.msra.mxu0 %v4161_v50  ;;  %3415 = vmatpush3.bf16.msra.mxu1 %v4164_v58 }
 0x6c6   :  { %3389 = vmatprep.subr.bf16.mxu0 %v4168_v3  ;;  %3416 = vmatprep.subr.bf16.mxu1 %v3713_v5  ;;  %v1980_v3 = vrot.slane %v1765_v35, 1 }
 0x6c9   :  { %3391 = vmatpush1.bf16.msra.mxu0 %v4171_v15  ;;  %3418 = vmatpush3.bf16.msra.mxu1 %v4174_v31 }
 0x6ca   :  { %3393 = vmatprep.subr.bf16.mxu0 %v4176_v33  ;;  %3419 = vmatprep.subr.bf16.mxu1 %v3713_v5 }
 0x6cd   :  { %3395 = vmatpush1.bf16.msra.mxu0 %v4179_v55  ;;  %3421 = vmatpush3.bf16.msra.mxu1 %v4183_v62 }
 0x6ce   :  { %3397 = vmatprep.subr.bf16.mxu0 %v4185_v43  ;;  %3422 = vmatprep.subr.bf16.mxu1 %v3713_v5 }
 0x6d1   :  { %3399 = vmatpush1.bf16.msra.mxu0 %v4189_v16  ;;  %3424 = vmatpush3.bf16.msra.mxu1 %v4193_v30  ;;  %v1827_v16 = vrot.slane %v1814_v13, %v4011_v48  ;;  %v2000_v13 = vld [vmem:[#allocation3 + $0x7] ss:$8 sm:$0x7]  ;;  %v2403_v48 = vld [vmem:[%s4413_s8] ss:$0 sm:$0xff] }
 0x6d2   :  { %3401 = vmatprep.subr.bf16.mxu0 %v4195_v18  ;;  %3425 = vmatprep.subr.bf16.mxu1 %v3713_v5 }
 0x6d5   :  { %3403 = vmatpush1.bf16.msra.mxu0 %v4199_v29  ;;  %3427 = vmatpush3.bf16.msra.mxu1 %v4203_v32 }
 0x6d6   :  { %3428 = vmatprep.subr.bf16.mxu0 %v3713_v5 }
 0x78b   :  { %v1897_v26 = vpop.f32.mrb[14].mxu0  ;;  %v1968_v28 = vpop.f32.mrb[14].mxu1 }
 0x78c   :  { %v1898_v45 = vadd.f32 %v1897_v26, %v1819_v17  ;;  %v1899_v53 = vpop.f32.mrb[15].mxu0  ;;  %v2853_v40 = vpop.f32.mrb[15].mxu1  ;;  %v1969_v18 = vadd.f32 %v1968_v28, %v1827_v16 }
 0x78d   :  { %v1900_v50 = vadd.f32 %v1899_v53, %v1823_v19 }
 0x78e   :  { %v1972_v58 = vadd.f32 %v1898_v45, %v1765_v35  ;;  %v2215_v45 = vrot.slane %v2000_v13, 1 }
 0x78f   :  { %v1982_v31 = vadd.f32 %v1980_v3, %v1900_v50 }
 0x790   :  { %v2399_v15 = vmul.f32 -1.442695, %v1972_v58 }
 0x791   :  { %v2400_v33 = vmul.f32 -1.442695, %v1982_v31 }
 0x792   :  { %3526 = vpow2.f32 %v2399_v15 }
 0x793   :  { %3528 = vpow2.f32 %v2400_v33 }
 0x79c   :  { %v3527_v55 = vpop.eup %3526 }
 0x79d   :  { %v1976_v62 = vadd.f32 1.0, %v3527_v55  ;;  %v3529_v43 = vpop.eup %3528  ;;  %v2225_v55 = vrot.slane %v2000_v13, 2 }
 0x79e   :  { %v1986_v30 = vadd.f32 1.0, %v3529_v43 }
 0x79f   :  { %3530 = vrcp.f32 %v1976_v62 }
 0x7a0   :  { %3532 = vrcp.f32 %v1986_v30 }
 0x7a9   :  { %v3531_v29 = vpop.eup %3530 }
 0x7aa   :  { %v1989_v32 = vmul.f32 %v3531_v29, %v1969_v18  ;;  %v3533_v63 = vpop.eup %3532 }
 0x7ab   :  { %v1994_v2 = vsub.f32 1.0, %v3533_v63  ;;  %v1996_v10 = vmul.f32 %v3533_v63, %v4311_v57 }
 0x7ac   :  { %v1992_v61 = vadd.f32 %v1990_v60, %v1989_v32 }
 0x7ae   :  { %3534 = vtanh.f32 %v1992_v61 }
 0x7b8   :  { %v3535_v6 = vpop.eup %3534 }
 0x7b9   :  { %v1995_v9 = vmul.f32 %v3535_v6, %v1994_v2 }
 0x7bb   :  { %v4357_v11 = vadd.f32 %v1996_v10, %v1995_v9 }
 0x7bd   :  { %1998 = vst [vmem:[#allocation4 + $0x6] sm:$0x1] %v4357_v11  ;;  %2131 = vmatmul.mubr.f32.vlgmr.msra.gmra.mrb[16].mxu0 %v4357_v11  ;;  %2887 = vmatmul.mubr.f32.vlgmr.msra.gmra.mrb[16].mxu1 %v4357_v11 }
 0x7be   :  { %2921 = vmatprep.mubr.msk.f32.mxu0 %vm3715_vm0, %v3714_v8  ;;  %3430 = vmatpush3.bf16.msra.mxu0 %v3429_v22  ;;  %v2243_v8 = vld [vmem:[#allocation13 + $0x38] sm:$0xff] }
 0x7bf   :  { %3431 = vmatprep.subr.bf16.mxu0 %v3713_v5  ;;  %v3438_v54 = vpack.c.bf16 %v2243_v8, %v2242_v7 }
 0x7c2   :  { %3433 = vmatpush3.bf16.msra.mxu0 %v3432_v36 }
 0x7c3   :  { %3434 = vmatprep.subr.bf16.mxu0 %v3713_v5 }
 0x7c6   :  { %3436 = vmatpush3.bf16.msra.mxu0 %v3435_v51 }
 0x7c7   :  { %3437 = vmatprep.subr.bf16.mxu0 %v3713_v5 }
 0x7ca   :  { %3439 = vmatpush3.bf16.msra.mxu0 %v3438_v54 }
 0x7cb   :  { %3440 = vmatprep.subr.bf16.mxu0 %v3713_v5 }
 0x7ce   :  { %3442 = vmatpush3.bf16.msra.mxu0 %v3441_v47 }
 0x7cf   :  { %3443 = vmatprep.subr.bf16.mxu0 %v3713_v5 }
 0x7d2   :  { %3445 = vmatpush3.bf16.msra.mxu0 %v3444_v1 }
 0x7d3   :  { %3446 = vmatprep.subr.bf16.mxu0 %v3713_v5 }
 0x7d6   :  { %3448 = vmatpush3.bf16.msra.mxu0 %v3447_v12 }
 0x7d7   :  { %3449 = vmatprep.subr.bf16.mxu0 %v3713_v5 }
 0x7da   :  { %3451 = vmatpush3.bf16.msra.mxu0 %v3450_v23 }
 0x890   :  { %v2132_v42 = vpop.f32.mrb[16].mxu0  ;;  %v2203_v57 = vpop.f32.mrb[16].mxu1 }
 0x891   :  { %v2133_v17 = vadd.f32 %v2132_v42, %v2054_v34  ;;  %v2134_v19 = vpop.f32.mrb[17].mxu0  ;;  %v2888_v26 = vpop.f32.mrb[17].mxu1  ;;  %v2204_v15 = vadd.f32 %v2203_v57, %v2062_v52 }
 0x892   :  { %v2135_v28 = vadd.f32 %v2134_v19, %v2058_v39 }
 0x893   :  { %v2207_v35 = vadd.f32 %v2133_v17, %v2000_v13 }
 0x894   :  { %v2217_v5 = vadd.f32 %v2215_v45, %v2135_v28 }
 0x895   :  { %v2401_v53 = vmul.f32 -1.442695, %v2207_v35 }
 0x896   :  { %v2402_v40 = vmul.f32 -1.442695, %v2217_v5 }
 0x897   :  { %3536 = vpow2.f32 %v2401_v53 }
 0x898   :  { %3538 = vpow2.f32 %v2402_v40 }
 0x8a1   :  { %v3537_v50 = vpop.eup %3536 }
 0x8a2   :  { %v2211_v58 = vadd.f32 1.0, %v3537_v50  ;;  %v3539_v46 = vpop.eup %3538 }
 0x8a3   :  { %v2221_v3 = vadd.f32 1.0, %v3539_v46 }
 0x8a4   :  { %3540 = vrcp.f32 %v2211_v58 }
 0x8a5   :  { %3542 = vrcp.f32 %v2221_v3 }
 0x8ae   :  { %v3541_v31 = vpop.eup %3540 }
 0x8af   :  { %v2224_v33 = vmul.f32 %v3541_v31, %v2204_v15  ;;  %v3543_v43 = vpop.eup %3542 }
 0x8b0   :  { %v2229_v16 = vsub.f32 1.0, %v3543_v43  ;;  %v2231_v29 = vmul.f32 %v3543_v43, %v4357_v11 }
 0x8b1   :  { %v2227_v62 = vadd.f32 %v2225_v55, %v2224_v33 }
 0x8b3   :  { %3544 = vtanh.f32 %v2227_v62 }
 0x8bd   :  { %v3545_v30 = vpop.eup %3544 }
 0x8be   :  { %v2230_v18 = vmul.f32 %v3545_v30, %v2229_v16 }
 0x8c0   :  { %v2232_v32 = vadd.f32 %v2231_v29, %v2230_v18 }
 0x8c2   :  { %2233 = vst [vmem:[#allocation4 + $0x7] sm:$0x1] %v2232_v32  ;;  %2234 = vst [vmem:[#allocation16] sm:$0x1] %v2232_v32 }
 0x8c9   :  { %v2235_v60 = vld [vmem:[#allocation4] sm:$0xff] }
 0x8ca   :  { %2922 = vmatmul.mubr.f32.vlgmr.msra.gmra.mrb[18].mxu0 %v2235_v60 }
 0x99d   :  { %v2325_v61 = vpop.f32.mrb[18].mxu0 }
 0x99e   :  { %v2326_v63 = vadd.f32 %v2403_v48, %v2325_v61  ;;  %v2923_v2 = vpop.f32.mrb[19].mxu0 }
 0x9a0   :  { %2329 = vmax.xlane.f32.xlu0 %v2326_v63 }
 0xa2d   :  { %v2330_v6 = vpop.xlane.xlu0 %2329 }
 0xa2e   :  { %v2331_v9 = vsub.f32 %v2326_v63, %v2330_v6 }
 0xa30   :  { %v2332_v10 = vmul.f32 1.442695, %v2331_v9 }
 0xa32   :  { %3546 = vpow2.f32 %v2332_v10 }
 0xa3c   :  { %v3547_v20 = vpop.eup %3546 }
 0xa3d   :  { %2334 = vadd.xlane.f32.xlu0 %v3547_v20 }
 0xa3e   :  { %3659 = shalt.err (!%p3656_p11)
}
 0xa3f   :  { %s3660_s25 = scalar_lea.hbm %s4415_s10, 16 }
 0xa40   :  { %p3661_p12 = scmp.ne.s32.totalorder %s4415_s10, %s3660_s25  ;;  %p3664_p13 = scmp.lt.u32.totalorder %s3660_s25, %s4415_s10 }
 0xa42   :  { %p3666_p0 = pnand %p3664_p13, %p3661_p12 }
 0xa44   :  { %3669 = shalt.err (!%p3666_p0)
}
 0xa45   :  { %2359 = dma.vmem_to_hbm [thread:$0]  %s2357_s21, 16, %s4415_s10, [#allocation17]  }
 0xa46   :  { %s3717_s11 = smov [#allocation15]  }
 0xa47   :  { %s2346_s13 = sshll.u32 %s3717_s11, 4  ;;  %s2347_s13 = int_to_ptr.vmem [resolvable:$true] %s2346_s13 }
 0xa48   :  { %s3670_s16 = scalar_lea.vmem %s2347_s13, 128  ;;  %p3675_p2 = scmp.lt.s32.totalorder %s2347_s13, %s2347_s13 }
 0xa49   :  { %p3671_p1 = scmp.ne.s32.totalorder %s2347_s13, %s3670_s16  ;;  %p3676_p3 = scmp.lt.s32.totalorder %s3670_s16, %s3670_s16 }
 0xa4b   :  { %p3677_p4 = por %p3676_p3, %p3675_p2 }
 0xa4d   :  { %p3678_p5 = pnand %p3677_p4, %p3671_p1 }
 0xaca   :  { %v2335_v11 = vpop.xlane.xlu0 %2334 }
 0xacb   :  { %3548 = vlog2.f32 %v2335_v11 }
 0xad5   :  { %v3549_v0 = vpop.eup %3548 }
 0xad6   :  { %v2337_v22 = vmul.f32 0.6931472, %v3549_v0 }
 0xad8   :  { %v2338_v25 = vsub.f32 %v2331_v9, %v2337_v22 }
 0xada   :  { %2339 = vst [vmem:[#allocation15] sm:$0xff] %v2338_v25 }
 0xadb   :  { %3681 = shalt.err (!%p3678_p5)
}
 0xadc   :  { %s3682_s10 = scalar_lea.hbm %s4414_s9, 128 }
 0xadd   :  { %p3683_p6 = scmp.ne.s32.totalorder %s4414_s9, %s3682_s10  ;;  %p3686_p7 = scmp.lt.u32.totalorder %s3682_s10, %s4414_s9 }
 0xadf   :  { %p3688_p8 = pnand %p3686_p7, %p3683_p6 }
 0xae1   :  { %3691 = shalt.err (!%p3688_p8)
}
 0xae2   :  { %2349 = dma.vmem_to_hbm [thread:$0]  %s2347_s13, 128, %s4414_s9, [#allocation7]  }
 0xae3   :  { %3700 = dma.done.wait [#allocation7], 128  }
 0xae4   :  { %3701 = vsyncadd [#allocation7], 4294967168 }
 0xae5   :  { %3702 = dma.done.wait [#allocation17], 16  }
 0xae6   :  { %3703 = vsyncadd [#allocation17], 4294967280 }
 0xae7   :  { %2366 = vsyncpa [#allocation6], 1 }
 0xae8   :  { %2367 = vsyncpa [#allocation11], 1 }
 0xae9   :  { %2368 = vsyncpa [#allocation14], 1 }
 0xaea   :  { %2369 = vsyncpa [#allocation7], 1 }
 0xaeb   :  { %2370 = vsyncpa [#allocation17], 1 }
 0xaec   :  { %2371 = vsyncpa [#allocation8], 1 }

</bundles_post_ra>
